<compile_context>
chip_gen: v7x
topology: tpu7x:2x2x1
jax: 0.10.0
libtpu: 0.0.40
codegen_flags: <defaults>
</compile_context>

<pallas_src>
import functools

import jax
import jax.numpy as jnp
from jax.experimental import pallas as pl
from jax.experimental.pallas import tpu as pltpu

_LANES = 128


def _round_up(x, m):
    return (x + m - 1) // m * m


def _same_pad(kernel_size, dilation):
    # replicates the padding arithmetic in Conv.__init__ for padding='same'
    p = kernel_size + (kernel_size - 1) * (dilation - 1)
    return p // 2 + (p % 2 - 1)


# ----------------------------------------------------------------------------
# Pass 1: per-image conv (per-tap MXU matmuls) + BN partial statistics
# ----------------------------------------------------------------------------
def _conv_stats_kernel(x_ref, w_ref, y_ref, sum_ref, sq_ref, xp_ref, *,
                       KH, KW, pad_h, pad_w, Cout):
    """One grid step = one image.

    x_ref:   (1, H, W, Cin)        NHWC image block
    w_ref:   (KH*KW, Cin, Cout_p)  per-tap weights, Cout zero-padded to lanes
    y_ref:   (1, Cout, H*W)        conv output, H*W on lanes (lane-dense)
    sum_ref: (1, 1, Cout_p)        per-image sum(conv)      (f32)
    sq_ref:  (1, 1, Cout_p)        per-image sum(conv**2)   (f32)
    xp_ref:  (Hp, Wp, Cin)         VMEM scratch: zero halo + image interior
    """
    _, H, W, Cin = x_ref.shape
    HW = H * W
    Hp, Wp, _ = xp_ref.shape
    dtype = xp_ref.dtype

    # 1) Zero only the 4 halo slabs (re-done every step: megacore-safe, tiny),
    #    then write the image interior exactly once (no double write).
    if pad_h > 0:
        xp_ref[:pad_h, :, :] = jnp.zeros((pad_h, Wp, Cin), dtype)
        xp_ref[pad_h + H:, :, :] = jnp.zeros((Hp - pad_h - H, Wp, Cin), dtype)
    if pad_w > 0:
        xp_ref[pad_h:pad_h + H, :pad_w, :] = jnp.zeros((H, pad_w, Cin), dtype)
        xp_ref[pad_h:pad_h + H, pad_w + W:, :] = (
            jnp.zeros((H, Wp - pad_w - W, Cin), dtype))
    xp_ref[pad_h:pad_h + H, pad_w:pad_w + W, :] = x_ref[0]

    # 2) Conv: KH*KW per-tap matmuls accumulated in f32 registers.
    #    No materialized im2col patch buffer and no patch stores.
    acc = None
    for kh in range(KH):
        for kw in range(KW):
            tap = xp_ref[kh:kh + H, kw:kw + W, :].reshape(HW, Cin)
            part = jnp.dot(tap, w_ref[kh * KW + kw],
                           preferred_element_type=jnp.float32)   # (HW, Cout_p)
            acc = part if acc is None else acc + part

    # 3) Single-pass BN partial statistics (lane-dense (1, Cout_p) outputs).
    sum_ref[0] = jnp.sum(acc, axis=0, keepdims=True)
    sq_ref[0] = jnp.sum(acc * acc, axis=0, keepdims=True)

    # 4) Lane-dense conv output: one XLU transpose so H*W sits on lanes, then
    #    store only the real Cout channels (free leading-dim slice).
    acc_t = jnp.transpose(acc)                                   # (Cout_p, HW)
    y_ref[0] = acc_t[:Cout, :].astype(y_ref.dtype)


# ----------------------------------------------------------------------------
# Pass 2: folded BN affine (+ optional ReLU)
# ----------------------------------------------------------------------------
def _affine_kernel(y_ref, scale_ref, shift_ref, o_ref, *, relu):
    y = y_ref[0].astype(jnp.float32)                 # (Cout, HW), HW on lanes
    out = y * scale_ref[...] + shift_ref[...]        # (Cout, 1) broadcasts
    if relu:
        out = jnp.maximum(out, 0.0)
    o_ref[0] = out.astype(o_ref.dtype)


# ----------------------------------------------------------------------------
# Wrapper
# ----------------------------------------------------------------------------
def conv_module_forward(x_nchw, w_oihw, gamma=None, beta=None, *,
                        kernel_size=3, stride=1, dilation=1, groups=1,
                        bn=True, relu=False, eps=1e-5):
    """Forward pass of Conv (NCHW in -> NCHW out)."""
    assert stride == 1 and dilation == 1 and groups == 1, (
        "Pallas kernel implements stride=1, dilation=1, groups=1 only")
    assert kernel_size % 2 == 1, "symmetric 'same' padding requires odd kernel"

    N, Cin, H, W = x_nchw.shape
    Cout, Cin_w, KH, KW = w_oihw.shape
    assert Cin_w == Cin and KH == kernel_size and KW == kernel_size

    pad_h = _same_pad(KH, dilation)
    pad_w = _same_pad(KW, dilation)
    Hp, Wp = H + 2 * pad_h, W + 2 * pad_w
    Cout_p = _round_up(Cout, _LANES)
    HW = H * W
    dtype = x_nchw.dtype

    # NCHW -> NHWC for the kernel (one small pass over the input).  The
    # output side needs no wrapper transpose/slice at all (see pass 1).
    x_nhwc = jnp.transpose(x_nchw, (0, 2, 3, 1))

    # OIHW -> (KH*KW, Cin, Cout_p) per-tap weight, Cout zero-padded to lanes.
    w_taps = jnp.transpose(w_oihw, (2, 3, 1, 0)).reshape(KH * KW, Cin, Cout)
    w_taps = jnp.pad(w_taps, ((0, 0), (0, 0), (0, Cout_p - Cout))).astype(dtype)

    conv_kernel = functools.partial(
        _conv_stats_kernel, KH=KH, KW=KW, pad_h=pad_h, pad_w=pad_w, Cout=Cout)

    y_conv, psum, psq = pl.pallas_call(
        conv_kernel,
        grid=(N,),
        in_specs=[
            pl.BlockSpec((1, H, W, Cin), lambda n: (n, 0, 0, 0)),
            pl.BlockSpec((KH * KW, Cin, Cout_p), lambda n: (0, 0, 0)),
        ],
        out_specs=(
            pl.BlockSpec((1, Cout, HW), lambda n: (n, 0, 0)),
            pl.BlockSpec((1, 1, Cout_p), lambda n: (n, 0, 0)),
            pl.BlockSpec((1, 1, Cout_p), lambda n: (n, 0, 0)),
        ),
        out_shape=(
            jax.ShapeDtypeStruct((N, Cout, HW), dtype),          # conv output
            jax.ShapeDtypeStruct((N, 1, Cout_p), jnp.float32),   # sum
            jax.ShapeDtypeStruct((N, 1, Cout_p), jnp.float32),   # sum of sq
        ),
        scratch_shapes=[pltpu.VMEM((Hp, Wp, Cin), dtype)],
        compiler_params=pltpu.CompilerParams(
            dimension_semantics=("parallel",),
            vmem_limit_bytes=32 * 1024 * 1024),
    )(x_nhwc, w_taps)

    if not bn and not relu:
        return y_conv.reshape(N, Cout, H, W)

    # Fold the BN statistics into a per-channel scale/shift (Cout scalars;
    # negligible XLA work between the two pallas_calls).
    if bn:
        count = float(N * HW)
        s = jnp.sum(psum[:, 0, :Cout], axis=0)
        ss = jnp.sum(psq[:, 0, :Cout], axis=0)
        mean = s / count
        var = jnp.maximum(ss / count - mean * mean, 0.0)   # biased (training)
        if gamma is None:
            gamma = jnp.ones((Cout,), jnp.float32)
        if beta is None:
            beta = jnp.zeros((Cout,), jnp.float32)
        scale = gamma.astype(jnp.float32) * jax.lax.rsqrt(var + eps)
        shift = beta.astype(jnp.float32) - mean * scale
    else:
        scale = jnp.ones((Cout,), jnp.float32)
        shift = jnp.zeros((Cout,), jnp.float32)
    scale = scale.reshape(Cout, 1)
    shift = shift.reshape(Cout, 1)

    affine_kernel = functools.partial(_affine_kernel, relu=relu)
    y = pl.pallas_call(
        affine_kernel,
        grid=(N,),
        in_specs=[
            pl.BlockSpec((1, Cout, HW), lambda n: (n, 0, 0)),
            pl.BlockSpec((Cout, 1), lambda n: (0, 0)),
            pl.BlockSpec((Cout, 1), lambda n: (0, 0)),
        ],
        out_specs=pl.BlockSpec((1, Cout, HW), lambda n: (n, 0, 0)),
        out_shape=jax.ShapeDtypeStruct((N, Cout, HW), dtype),
        compiler_params=pltpu.CompilerParams(
            dimension_semantics=("parallel",),
            vmem_limit_bytes=32 * 1024 * 1024),
    )(y_conv, scale, shift)

    return y.reshape(N, Cout, H, W)                     # free metadata reshape


# ----------------------------------------------------------------------------
# Main
# ----------------------------------------------------------------------------
if __name__ == "__main__":
    key = jax.random.PRNGKey(0)
    kx, kw = jax.random.split(key)

    N, Cin, H, W = 2, 4, 16, 16
    Cout, K = 8, 3

    x = jax.random.normal(kx, (N, Cin, H, W), dtype=jnp.float32)

    # kaiming_normal_ (fan_in, gain=sqrt(2)) on weight of shape (O, I, KH, KW)
    fan_in = Cin * K * K
    std = (2.0 / fan_in) ** 0.5
    w = jax.random.normal(kw, (Cout, Cin, K, K), dtype=jnp.float32) * std

    gamma = jnp.ones((Cout,), jnp.float32)   # BatchNorm2d default weight
    beta = jnp.zeros((Cout,), jnp.float32)   # BatchNorm2d default bias

    out = conv_module_forward(x, w, gamma, beta,
                              kernel_size=K, bn=True, relu=False)
    out = jax.block_until_ready(out)

    out_relu = conv_module_forward(x, w, gamma, beta,
                                   kernel_size=K, bn=True, relu=True)
    out_relu = jax.block_until_ready(out_relu)

    # Pure-JAX reference (conv + training-mode batch norm) for sanity check.
    ref_conv = jax.lax.conv_general_dilated(
        x, w, window_strides=(1, 1), padding=((1, 1), (1, 1)),
        dimension_numbers=("NCHW", "OIHW", "NCHW"))
    mean = jnp.mean(ref_conv, axis=(0, 2, 3), keepdims=True)
    var = jnp.mean((ref_conv - mean) ** 2, axis=(0, 2, 3), keepdims=True)
    ref = (ref_conv - mean) / jnp.sqrt(var + 1e-5)
    ref = ref * gamma.reshape(1, -1, 1, 1) + beta.reshape(1, -1, 1, 1)
    ref_relu = jnp.maximum(ref, 0.0)

    assert out.shape == (N, Cout, H, W)
    assert jnp.allclose(out, ref, atol=1e-3, rtol=1e-3), \
        float(jnp.max(jnp.abs(out - ref)))
    assert jnp.allclose(out_relu, ref_relu, atol=1e-3, rtol=1e-3), \
        float(jnp.max(jnp.abs(out_relu - ref_relu)))

    print("KERNEL_OK")
</pallas_src>

<mosaic_0001>
module attributes {stable_mosaic.version = 11 : i64} {
  func.func @_conv_stats_kernel(%arg0: i32, %arg1: memref<1x16x16x4xf32, #tpu.memory_space<vmem>>, %arg2: memref<9x4x128xf32, #tpu.memory_space<vmem>>, %arg3: memref<1x8x256xf32, #tpu.memory_space<vmem>>, %arg4: memref<1x1x128xf32, #tpu.memory_space<vmem>>, %arg5: memref<1x1x128xf32, #tpu.memory_space<vmem>>, %arg6: memref<18x18x4xf32, #tpu.memory_space<vmem>>) attributes {dimension_semantics = [#tpu.dimension_semantics<parallel>], iteration_bounds = array<i64: 2>, scalar_prefetch = 0 : i64, scratch_operands = 1 : i64, tpu.core_type = #tpu.core_type<tc>, window_params = [{transform_indices = @transform_0, window_bounds = array<i64: 1, 16, 16, 4>}, {pipeline_mode = #tpu.pipeline_mode<synchronous>, transform_indices = @transform_1, window_bounds = array<i64: 9, 4, 128>}, {transform_indices = @transform_2, window_bounds = array<i64: 1, 8, 256>}, {transform_indices = @transform_3, window_bounds = array<i64: 1, 1, 128>}, {transform_indices = @transform_4, window_bounds = array<i64: 1, 1, 128>}]} {
    %cst = arith.constant 0.000000e+00 : f32
    %0 = vector.broadcast %cst : f32 to vector<1x18x4xf32>
    %c0 = arith.constant 0 : index
    %c0_0 = arith.constant 0 : index
    %c0_1 = arith.constant 0 : index
    %1 = vector.load %arg6[%c0, %c0_0, %c0_1] : memref<18x18x4xf32, #tpu.memory_space<vmem>>, vector<1x18x4xf32>
    tpu.vector_store %arg6[%c0, %c0_0, %c0_1], %0 {strides = array<i32>} : memref<18x18x4xf32, #tpu.memory_space<vmem>>, vector<1x18x4xf32>,
    %cst_2 = arith.constant 0.000000e+00 : f32
    %2 = vector.broadcast %cst_2 : f32 to vector<1x18x4xf32>
    %c17 = arith.constant 17 : index
    %c0_3 = arith.constant 0 : index
    %c0_4 = arith.constant 0 : index
    %3 = vector.load %arg6[%c17, %c0_3, %c0_4] : memref<18x18x4xf32, #tpu.memory_space<vmem>>, vector<1x18x4xf32>
    tpu.vector_store %arg6[%c17, %c0_3, %c0_4], %2 {strides = array<i32>} : memref<18x18x4xf32, #tpu.memory_space<vmem>>, vector<1x18x4xf32>,
    %cst_5 = arith.constant 0.000000e+00 : f32
    %4 = vector.broadcast %cst_5 : f32 to vector<16x1x4xf32>
    %c1 = arith.constant 1 : index
    %c0_6 = arith.constant 0 : index
    %c0_7 = arith.constant 0 : index
    %5 = vector.load %arg6[%c1, %c0_6, %c0_7] : memref<18x18x4xf32, #tpu.memory_space<vmem>>, vector<16x1x4xf32>
    tpu.vector_store %arg6[%c1, %c0_6, %c0_7], %4 {strides = array<i32>} : memref<18x18x4xf32, #tpu.memory_space<vmem>>, vector<16x1x4xf32>,
    %cst_8 = arith.constant 0.000000e+00 : f32
    %6 = vector.broadcast %cst_8 : f32 to vector<16x1x4xf32>
    %c1_9 = arith.constant 1 : index
    %c17_10 = arith.constant 17 : index
    %c0_11 = arith.constant 0 : index
    %7 = vector.load %arg6[%c1_9, %c17_10, %c0_11] : memref<18x18x4xf32, #tpu.memory_space<vmem>>, vector<16x1x4xf32>
    tpu.vector_store %arg6[%c1_9, %c17_10, %c0_11], %6 {strides = array<i32>} : memref<18x18x4xf32, #tpu.memory_space<vmem>>, vector<16x1x4xf32>,
    %c0_12 = arith.constant 0 : index
    %c0_13 = arith.constant 0 : index
    %c0_14 = arith.constant 0 : index
    %c0_15 = arith.constant 0 : index
    %8 = vector.load %arg1[%c0_12, %c0_13, %c0_14, %c0_15] : memref<1x16x16x4xf32, #tpu.memory_space<vmem>>, vector<1x16x16x4xf32>
    %9 = vector.shape_cast %8 : vector<1x16x16x4xf32> to vector<16x16x4xf32>
    %c1_16 = arith.constant 1 : index
    %c1_17 = arith.constant 1 : index
    %c0_18 = arith.constant 0 : index
    %10 = vector.load %arg6[%c1_16, %c1_17, %c0_18] : memref<18x18x4xf32, #tpu.memory_space<vmem>>, vector<16x16x4xf32>
    tpu.vector_store %arg6[%c1_16, %c1_17, %c0_18], %9 {strides = array<i32>} : memref<18x18x4xf32, #tpu.memory_space<vmem>>, vector<16x16x4xf32>,
    %c0_19 = arith.constant 0 : index
    %c0_20 = arith.constant 0 : index
    %c0_21 = arith.constant 0 : index
    %11 = vector.load %arg6[%c0_19, %c0_20, %c0_21] : memref<18x18x4xf32, #tpu.memory_space<vmem>>, vector<16x16x4xf32>
    %12 = vector.shape_cast %11 : vector<16x16x4xf32> to vector<256x4xf32>
    %c0_22 = arith.constant 0 : index
    %c0_23 = arith.constant 0 : index
    %c0_24 = arith.constant 0 : index
    %13 = vector.load %arg2[%c0_22, %c0_23, %c0_24] : memref<9x4x128xf32, #tpu.memory_space<vmem>>, vector<1x4x128xf32>
    %14 = vector.shape_cast %13 : vector<1x4x128xf32> to vector<4x128xf32>
    %cst_25 = arith.constant dense<0.000000e+00> : vector<256x128xf32>
    %15 = tpu.matmul %12, %14, %cst_25 {dimension_numbers = #tpu.dot_dimension_numbers<[1], [0], [0], [1], [0, 0, 1, 1], [], []>} : vector<256x4xf32>, vector<4x128xf32>, vector<256x128xf32> -> vector<256x128xf32>
    %c0_26 = arith.constant 0 : index
    %c1_27 = arith.constant 1 : index
    %c0_28 = arith.constant 0 : index
    %16 = vector.load %arg6[%c0_26, %c1_27, %c0_28] : memref<18x18x4xf32, #tpu.memory_space<vmem>>, vector<16x16x4xf32>
    %17 = vector.shape_cast %16 : vector<16x16x4xf32> to vector<256x4xf32>
    %c1_29 = arith.constant 1 : index
    %c0_30 = arith.constant 0 : index
    %c0_31 = arith.constant 0 : index
    %18 = vector.load %arg2[%c1_29, %c0_30, %c0_31] : memref<9x4x128xf32, #tpu.memory_space<vmem>>, vector<1x4x128xf32>
    %19 = vector.shape_cast %18 : vector<1x4x128xf32> to vector<4x128xf32>
    %cst_32 = arith.constant dense<0.000000e+00> : vector<256x128xf32>
    %20 = tpu.matmul %17, %19, %cst_32 {dimension_numbers = #tpu.dot_dimension_numbers<[1], [0], [0], [1], [0, 0, 1, 1], [], []>} : vector<256x4xf32>, vector<4x128xf32>, vector<256x128xf32> -> vector<256x128xf32>
    %21 = arith.addf %15, %20 : vector<256x128xf32>
    %c0_33 = arith.constant 0 : index
    %c2 = arith.constant 2 : index
    %c0_34 = arith.constant 0 : index
    %22 = vector.load %arg6[%c0_33, %c2, %c0_34] : memref<18x18x4xf32, #tpu.memory_space<vmem>>, vector<16x16x4xf32>
    %23 = vector.shape_cast %22 : vector<16x16x4xf32> to vector<256x4xf32>
    %c2_35 = arith.constant 2 : index
    %c0_36 = arith.constant 0 : index
    %c0_37 = arith.constant 0 : index
    %24 = vector.load %arg2[%c2_35, %c0_36, %c0_37] : memref<9x4x128xf32, #tpu.memory_space<vmem>>, vector<1x4x128xf32>
    %25 = vector.shape_cast %24 : vector<1x4x128xf32> to vector<4x128xf32>
    %cst_38 = arith.constant dense<0.000000e+00> : vector<256x128xf32>
    %26 = tpu.matmul %23, %25, %cst_38 {dimension_numbers = #tpu.dot_dimension_numbers<[1], [0], [0], [1], [0, 0, 1, 1], [], []>} : vector<256x4xf32>, vector<4x128xf32>, vector<256x128xf32> -> vector<256x128xf32>
    %27 = arith.addf %21, %26 : vector<256x128xf32>
    %c1_39 = arith.constant 1 : index
    %c0_40 = arith.constant 0 : index
    %c0_41 = arith.constant 0 : index
    %28 = vector.load %arg6[%c1_39, %c0_40, %c0_41] : memref<18x18x4xf32, #tpu.memory_space<vmem>>, vector<16x16x4xf32>
    %29 = vector.shape_cast %28 : vector<16x16x4xf32> to vector<256x4xf32>
    %c3 = arith.constant 3 : index
    %c0_42 = arith.constant 0 : index
    %c0_43 = arith.constant 0 : index
    %30 = vector.load %arg2[%c3, %c0_42, %c0_43] : memref<9x4x128xf32, #tpu.memory_space<vmem>>, vector<1x4x128xf32>
    %31 = vector.shape_cast %30 : vector<1x4x128xf32> to vector<4x128xf32>
    %cst_44 = arith.constant dense<0.000000e+00> : vector<256x128xf32>
    %32 = tpu.matmul %29, %31, %cst_44 {dimension_numbers = #tpu.dot_dimension_numbers<[1], [0], [0], [1], [0, 0, 1, 1], [], []>} : vector<256x4xf32>, vector<4x128xf32>, vector<256x128xf32> -> vector<256x128xf32>
    %33 = arith.addf %27, %32 : vector<256x128xf32>
    %c1_45 = arith.constant 1 : index
    %c1_46 = arith.constant 1 : index
    %c0_47 = arith.constant 0 : index
    %34 = vector.load %arg6[%c1_45, %c1_46, %c0_47] : memref<18x18x4xf32, #tpu.memory_space<vmem>>, vector<16x16x4xf32>
    %35 = vector.shape_cast %34 : vector<16x16x4xf32> to vector<256x4xf32>
    %c4 = arith.constant 4 : index
    %c0_48 = arith.constant 0 : index
    %c0_49 = arith.constant 0 : index
    %36 = vector.load %arg2[%c4, %c0_48, %c0_49] : memref<9x4x128xf32, #tpu.memory_space<vmem>>, vector<1x4x128xf32>
    %37 = vector.shape_cast %36 : vector<1x4x128xf32> to vector<4x128xf32>
    %cst_50 = arith.constant dense<0.000000e+00> : vector<256x128xf32>
    %38 = tpu.matmul %35, %37, %cst_50 {dimension_numbers = #tpu.dot_dimension_numbers<[1], [0], [0], [1], [0, 0, 1, 1], [], []>} : vector<256x4xf32>, vector<4x128xf32>, vector<256x128xf32> -> vector<256x128xf32>
    %39 = arith.addf %33, %38 : vector<256x128xf32>
    %c1_51 = arith.constant 1 : index
    %c2_52 = arith.constant 2 : index
    %c0_53 = arith.constant 0 : index
    %40 = vector.load %arg6[%c1_51, %c2_52, %c0_53] : memref<18x18x4xf32, #tpu.memory_space<vmem>>, vector<16x16x4xf32>
    %41 = vector.shape_cast %40 : vector<16x16x4xf32> to vector<256x4xf32>
    %c5 = arith.constant 5 : index
    %c0_54 = arith.constant 0 : index
    %c0_55 = arith.constant 0 : index
    %42 = vector.load %arg2[%c5, %c0_54, %c0_55] : memref<9x4x128xf32, #tpu.memory_space<vmem>>, vector<1x4x128xf32>
    %43 = vector.shape_cast %42 : vector<1x4x128xf32> to vector<4x128xf32>
    %cst_56 = arith.constant dense<0.000000e+00> : vector<256x128xf32>
    %44 = tpu.matmul %41, %43, %cst_56 {dimension_numbers = #tpu.dot_dimension_numbers<[1], [0], [0], [1], [0, 0, 1, 1], [], []>} : vector<256x4xf32>, vector<4x128xf32>, vector<256x128xf32> -> vector<256x128xf32>
    %45 = arith.addf %39, %44 : vector<256x128xf32>
    %c2_57 = arith.constant 2 : index
    %c0_58 = arith.constant 0 : index
    %c0_59 = arith.constant 0 : index
    %46 = vector.load %arg6[%c2_57, %c0_58, %c0_59] : memref<18x18x4xf32, #tpu.memory_space<vmem>>, vector<16x16x4xf32>
    %47 = vector.shape_cast %46 : vector<16x16x4xf32> to vector<256x4xf32>
    %c6 = arith.constant 6 : index
    %c0_60 = arith.constant 0 : index
    %c0_61 = arith.constant 0 : index
    %48 = vector.load %arg2[%c6, %c0_60, %c0_61] : memref<9x4x128xf32, #tpu.memory_space<vmem>>, vector<1x4x128xf32>
    %49 = vector.shape_cast %48 : vector<1x4x128xf32> to vector<4x128xf32>
    %cst_62 = arith.constant dense<0.000000e+00> : vector<256x128xf32>
    %50 = tpu.matmul %47, %49, %cst_62 {dimension_numbers = #tpu.dot_dimension_numbers<[1], [0], [0], [1], [0, 0, 1, 1], [], []>} : vector<256x4xf32>, vector<4x128xf32>, vector<256x128xf32> -> vector<256x128xf32>
    %51 = arith.addf %45, %50 : vector<256x128xf32>
    %c2_63 = arith.constant 2 : index
    %c1_64 = arith.constant 1 : index
    %c0_65 = arith.constant 0 : index
    %52 = vector.load %arg6[%c2_63, %c1_64, %c0_65] : memref<18x18x4xf32, #tpu.memory_space<vmem>>, vector<16x16x4xf32>
    %53 = vector.shape_cast %52 : vector<16x16x4xf32> to vector<256x4xf32>
    %c7 = arith.constant 7 : index
    %c0_66 = arith.constant 0 : index
    %c0_67 = arith.constant 0 : index
    %54 = vector.load %arg2[%c7, %c0_66, %c0_67] : memref<9x4x128xf32, #tpu.memory_space<vmem>>, vector<1x4x128xf32>
    %55 = vector.shape_cast %54 : vector<1x4x128xf32> to vector<4x128xf32>
    %cst_68 = arith.constant dense<0.000000e+00> : vector<256x128xf32>
    %56 = tpu.matmul %53, %55, %cst_68 {dimension_numbers = #tpu.dot_dimension_numbers<[1], [0], [0], [1], [0, 0, 1, 1], [], []>} : vector<256x4xf32>, vector<4x128xf32>, vector<256x128xf32> -> vector<256x128xf32>
    %57 = arith.addf %51, %56 : vector<256x128xf32>
    %c2_69 = arith.constant 2 : index
    %c2_70 = arith.constant 2 : index
    %c0_71 = arith.constant 0 : index
    %58 = vector.load %arg6[%c2_69, %c2_70, %c0_71] : memref<18x18x4xf32, #tpu.memory_space<vmem>>, vector<16x16x4xf32>
    %59 = vector.shape_cast %58 : vector<16x16x4xf32> to vector<256x4xf32>
    %c8 = arith.constant 8 : index
    %c0_72 = arith.constant 0 : index
    %c0_73 = arith.constant 0 : index
    %60 = vector.load %arg2[%c8, %c0_72, %c0_73] : memref<9x4x128xf32, #tpu.memory_space<vmem>>, vector<1x4x128xf32>
    %61 = vector.shape_cast %60 : vector<1x4x128xf32> to vector<4x128xf32>
    %cst_74 = arith.constant dense<0.000000e+00> : vector<256x128xf32>
    %62 = tpu.matmul %59, %61, %cst_74 {dimension_numbers = #tpu.dot_dimension_numbers<[1], [0], [0], [1], [0, 0, 1, 1], [], []>} : vector<256x4xf32>, vector<4x128xf32>, vector<256x128xf32> -> vector<256x128xf32>
    %63 = arith.addf %57, %62 : vector<256x128xf32>
    %cst_75 = arith.constant dense<0.000000e+00> : vector<128xf32>
    %64 = vector.multi_reduction <add>, %63, %cst_75 [0] : vector<256x128xf32> to vector<128xf32>
    %65 = vector.shape_cast %64 : vector<128xf32> to vector<1x128xf32>
    %c0_76 = arith.constant 0 : index
    %c0_77 = arith.constant 0 : index
    %c0_78 = arith.constant 0 : index
    %66 = vector.load %arg4[%c0_76, %c0_77, %c0_78] : memref<1x1x128xf32, #tpu.memory_space<vmem>>, vector<1x1x128xf32>
    %67 = vector.shape_cast %66 : vector<1x1x128xf32> to vector<1x128xf32>
    %68 = vector.shape_cast %65 : vector<1x128xf32> to vector<1x1x128xf32>
    tpu.vector_store %arg4[%c0_76, %c0_77, %c0_78], %68 {strides = array<i32>} : memref<1x1x128xf32, #tpu.memory_space<vmem>>, vector<1x1x128xf32>,
    %69 = arith.mulf %63, %63 : vector<256x128xf32>
    %cst_79 = arith.constant dense<0.000000e+00> : vector<128xf32>
    %70 = vector.multi_reduction <add>, %69, %cst_79 [0] : vector<256x128xf32> to vector<128xf32>
    %71 = vector.shape_cast %70 : vector<128xf32> to vector<1x128xf32>
    %c0_80 = arith.constant 0 : index
    %c0_81 = arith.constant 0 : index
    %c0_82 = arith.constant 0 : index
    %72 = vector.load %arg5[%c0_80, %c0_81, %c0_82] : memref<1x1x128xf32, #tpu.memory_space<vmem>>, vector<1x1x128xf32>
    %73 = vector.shape_cast %72 : vector<1x1x128xf32> to vector<1x128xf32>
    %74 = vector.shape_cast %71 : vector<1x128xf32> to vector<1x1x128xf32>
    tpu.vector_store %arg5[%c0_80, %c0_81, %c0_82], %74 {strides = array<i32>} : memref<1x1x128xf32, #tpu.memory_space<vmem>>, vector<1x1x128xf32>,
    %75 = tpu.transpose %63, [1, 0] : vector<256x128xf32> -> vector<128x256xf32>
    %76 = vector.extract_strided_slice %75 {offsets = [0, 0], sizes = [8, 256], strides = [1, 1]} : vector<128x256xf32> to vector<8x256xf32>
    %c0_83 = arith.constant 0 : index
    %c0_84 = arith.constant 0 : index
    %c0_85 = arith.constant 0 : index
    %77 = vector.load %arg3[%c0_83, %c0_84, %c0_85] : memref<1x8x256xf32, #tpu.memory_space<vmem>>, vector<1x8x256xf32>
    %78 = vector.shape_cast %77 : vector<1x8x256xf32> to vector<8x256xf32>
    %79 = vector.shape_cast %76 : vector<8x256xf32> to vector<1x8x256xf32>
    tpu.vector_store %arg3[%c0_83, %c0_84, %c0_85], %79 {strides = array<i32>} : memref<1x8x256xf32, #tpu.memory_space<vmem>>, vector<1x8x256xf32>,
    return
  }
  func.func @transform_0(%arg0: i32) -> (i32, i32, i32, i32) {
    %c0_i32 = arith.constant 0 : i32
    %c0_i32_0 = arith.constant 0 : i32
    %c0_i32_1 = arith.constant 0 : i32
    %c0_i32_2 = arith.constant 0 : i32
    return %arg0, %c0_i32, %c0_i32_0, %c0_i32_1 : i32, i32, i32, i32
  }
  func.func @transform_1(%arg0: i32) -> (i32, i32, i32) {
    %c0_i32 = arith.constant 0 : i32
    %c0_i32_0 = arith.constant 0 : i32
    %c0_i32_1 = arith.constant 0 : i32
    %c0_i32_2 = arith.constant 0 : i32
    return %c0_i32, %c0_i32_0, %c0_i32_1 : i32, i32, i32
  }
  func.func @transform_2(%arg0: i32) -> (i32, i32, i32) {
    %c0_i32 = arith.constant 0 : i32
    %c0_i32_0 = arith.constant 0 : i32
    %c0_i32_1 = arith.constant 0 : i32
    return %arg0, %c0_i32, %c0_i32_0 : i32, i32, i32
  }
  func.func @transform_3(%arg0: i32) -> (i32, i32, i32) {
    %c0_i32 = arith.constant 0 : i32
    %c0_i32_0 = arith.constant 0 : i32
    %c0_i32_1 = arith.constant 0 : i32
    return %arg0, %c0_i32, %c0_i32_0 : i32, i32, i32
  }
  func.func @transform_4(%arg0: i32) -> (i32, i32, i32) {
    %c0_i32 = arith.constant 0 : i32
    %c0_i32_0 = arith.constant 0 : i32
    %c0_i32_1 = arith.constant 0 : i32
    return %arg0, %c0_i32, %c0_i32_0 : i32, i32, i32
  }
}

</mosaic_0001>

<bundles_post_ra>
// kernel: tpu_custom_call.1
= control target key start
LH: loop header
LB: loop body
LE: loop exit
PB: predicated region body
PF: predicated region fallthrough
CT: control target
= control target key end

     0   :  { %10 = vsyncpa [#allocation4], 0  ;;  %s6827_s0 = inlined_call_operand.vmem [shape: f32[2,16,16,4], index: 0, kind: input, shape index: {}]   ;;  %s6828_s1 = inlined_call_operand.vmem [shape: f32[9,4,128], index: 1, kind: input, shape index: {}]   ;;  %s6829_s2 = inlined_call_operand.hbm [shape: f32[2,8,256], index: 2, kind: output, shape index: {0}]   ;;  %s6830_s3 = inlined_call_operand.hbm [shape: f32[2,1,128], index: 3, kind: output, shape index: {1}]   ;;  %s6831_s4 = inlined_call_operand.hbm [shape: f32[2,1,128], index: 4, kind: output, shape index: {2}]  }
   0x1   :  { %12 = vsyncpa [#allocation4 + $0x1], 0 }
   0x2   :  { %13 = vsyncpa [#allocation6], 0 }
   0x3   :  { %15 = vsyncpa [#allocation6 + $0x1], 0  ;;  %s5630_s15 = smov 0   ;;  %s5632_s16 = smov 0  }
   0x4   :  { %s5634_s17 = smov 0   ;;  %s5636_s18 = smov 0  }
   0x5 LB: > { %s5651_s19 = sadd.s32 4294967295, %s5599_s18   ;;  %s4101_s20 = sadd.s32 4294967294, %s5599_s18   ;;  %s5599_s18 = sphi %s5636_s18, %s6943_s18   ;;  %s5595_s17 = sphi %s5634_s17, %s6942_s17   ;;  %s5591_s16 = sphi %s5632_s16, %s6941_s16   ;;  %s5587_s15 = sphi %s5630_s15, %s6940_s15  }
   0x6   : > { %s5655_s21 = sadd.s32 1, %s5599_s18   ;;  %s75_s22 = sadd.s32 1, %s5595_s17 }
   0x7   : > { %s72_s23 = ssub.s32 %s5599_s18, %s5655_s21  ;;  %p85_p0 = scmp.ne.s32.totalorder %s5595_s17, %s5591_s16 }
   0x8   : > { %p73_p1 = scmp.eq.s32.totalorder %s72_s23, 0  ;;  %p86_p2 = scmp.eq.s32.totalorder %s5651_s19, 1 }
   0x9   : > { %p91_p3 = scmp.ne.s32.totalorder %s5591_s16, %s5587_s15  ;;  %p92_p4 = scmp.eq.s32.totalorder %s4101_s20, 1 }
   0xa   : > { %s5668_s24 = scalar_select %p73_p1, %s5595_s17, %s75_s22  }
   0xb   : > { %p5670_p5 = por %p86_p2, %p85_p0  ;;  %p5674_p6 = por %p92_p4, %p91_p3 }
   0xc   : > { %p4104_p7 = scmp.ge.s32.totalorder %s5599_s18, 1  ;;  %p173_p8 = scmp.lt.s32.totalorder %s5599_s18, 3 }
   0xe   : > { %p174_p9 = pnand %p4104_p7, %p173_p8 }
  0x10   : > { %177 = sbr.rel (%p174_p9) target bundleno = 697 (0x2b9), region = 28 }
  0x17   : > { %v4108_v0 = vld [vmem:[%s6828_s1 + $0x4] sm:$0xf]  ;;  %vm482_vm0 = vcmask 1043456   ;;  %vm212_vm1 = vcmask 31744   ;;  %vm215_vm2 = vcmask 25600   ;;  %v5601_v1 = vmov 0.0  }
  0x18   : > { %4719 = vmatprep.subr.msk.mxu1 %vm482_vm0, %v4108_v0  ;;  %213 = vst.msk [vmem:[#allocation2] sm:$0xff] %vm212_vm1, %v5601_v1  ;;  %214 = vst.msk [vmem:[#allocation2 + $0x8] sm:$0xff] %vm212_vm1, %v5601_v1  ;;  %v5691_v2 = vld [vmem:[%s6828_s1 + $0x10] sm:$0xf]  ;;  %p207_p10 = scmp.lt.s32.totalorder %s5651_s19, 1  ;;  %vm222_vm3 = vcmask 24576  }
  0x19   : > { %218 = vst.msk [vmem:[#allocation2 + $0x198] sm:$0xff] %vm212_vm1, %v5601_v1  ;;  %219 = vst.msk [vmem:[#allocation2 + $0x1a0] sm:$0xff] %vm212_vm1, %v5601_v1  ;;  %v5697_v3 = vld [vmem:[%s6828_s1] sm:$0xf]  ;;  %4720 = vmatpush3.msk.msra.mxu1 %vm482_vm0, %v4108_v0  ;;  %4919 = vmatprep.subr.msk.mxu0 %vm482_vm0, %v5691_v2  ;;  %v5705_v4 = vld [vmem:[%s6828_s1 + $0x14] sm:$0xf] }
  0x1a   : > { %216 = vst.msk [vmem:[#allocation2 + $0x10] sm:$0x3] %vm215_vm2, %v5601_v1  ;;  %220 = vst.msk [vmem:[#allocation2 + $0x1a8] sm:$0x3] %vm215_vm2, %v5601_v1  ;;  %4920 = vmatpush3.msk.msra.mxu0 %vm482_vm0, %v5691_v2  ;;  %s208_s9 = scalar_select %p207_p10, %s5651_s19, 1  ;;  %4769 = vmatprep.subr.msk.mxu1 %vm482_vm0, %v5697_v3 }
  0x1b   : > { %239 = vst.msk [vmem:[#allocation2 + $0x29] sm:$0x1] %vm222_vm3, %v5601_v1  ;;  %223 = vst.msk [vmem:[#allocation2 + $0x18] sm:$0x1] %vm222_vm3, %v5601_v1  ;;  %4969 = vmatprep.subr.msk.mxu0 %vm482_vm0, %v5705_v4  ;;  %v5759_v8 = vld [vmem:[%s6828_s1 + $0x8] sm:$0xf] }
  0x1c   : > { %224 = vst.msk [vmem:[#allocation2 + $0x30] sm:$0x1] %vm222_vm3, %v5601_v1  ;;  %225 = vst.msk [vmem:[#allocation2 + $0x48] sm:$0x1] %vm222_vm3, %v5601_v1  ;;  %s4420_s10 = sshll.u32 %s208_s9, 8  ;;  %s6702_s8 = sand.u32 1, %s5591_s16  }
  0x1d   : > { %226 = vst.msk [vmem:[#allocation2 + $0x60] sm:$0x1] %vm222_vm3, %v5601_v1  ;;  %227 = vst.msk [vmem:[#allocation2 + $0x78] sm:$0x1] %vm222_vm3, %v5601_v1  ;;  %s5751_s13 = scalar_lea.vmem %s6827_s0, %s4420_s10  ;;  %v5815_v33 = vld [vmem:[%s6828_s1 + $0x18] sm:$0xf] }
  0x1e   : > { %228 = vst.msk [vmem:[#allocation2 + $0x90] sm:$0x1] %vm222_vm3, %v5601_v1  ;;  %229 = vst.msk [vmem:[#allocation2 + $0xa8] sm:$0x1] %vm222_vm3, %v5601_v1  ;;  %v255_v5 = vld [vmem:[%s5751_s13] sm:$0xff]  ;;  %v256_v6 = vld [vmem:[%s5751_s13 + $0x8] sm:$0xff] }
  0x1f   : > { %230 = vst.msk [vmem:[#allocation2 + $0xc0] sm:$0x1] %vm222_vm3, %v5601_v1  ;;  %231 = vst.msk [vmem:[#allocation2 + $0xd8] sm:$0x1] %vm222_vm3, %v5601_v1  ;;  %v257_v7 = vld [vmem:[%s5751_s13 + $0x10] sm:$0xff]  ;;  %v352_v9 = vld [vmem:[#allocation2 + $0x1] sm:$0xff] }
  0x20   : > { %232 = vst.msk [vmem:[#allocation2 + $0xf0] sm:$0x1] %vm222_vm3, %v5601_v1  ;;  %233 = vst.msk [vmem:[#allocation2 + $0x108] sm:$0x1] %vm222_vm3, %v5601_v1  ;;  %v258_v11 = vld [vmem:[%s5751_s13 + $0x18] sm:$0xff]  ;;  %4721 = vmatprep.mubr.msk.f32.mxu1 %vm212_vm1, %v352_v9  ;;  %v259_v12 = vld [vmem:[%s5751_s13 + $0x20] sm:$0xff] }
  0x21   : > { %234 = vst.msk [vmem:[#allocation2 + $0x120] sm:$0x1] %vm222_vm3, %v5601_v1  ;;  %235 = vst.msk [vmem:[#allocation2 + $0x138] sm:$0x1] %vm222_vm3, %v5601_v1  ;;  %v353_v10 = vld [vmem:[#allocation2 + $0x9] sm:$0xff]  ;;  %v262_v15 = vld [vmem:[%s5751_s13 + $0x38] sm:$0xff] }
  0x22   : > { %236 = vst.msk [vmem:[#allocation2 + $0x150] sm:$0x1] %vm222_vm3, %v5601_v1  ;;  %237 = vst.msk [vmem:[#allocation2 + $0x168] sm:$0x1] %vm222_vm3, %v5601_v1  ;;  %v260_v13 = vld [vmem:[%s5751_s13 + $0x28] sm:$0xff]  ;;  %v261_v14 = vld [vmem:[%s5751_s13 + $0x30] sm:$0xff]  ;;  %4722 = vmatmul.mubr.msk.f32.vlgmr.msra.gmra.mrb[0].mxu1 %vm212_vm1, %v353_v10 }
  0x23   : > { %238 = vst.msk [vmem:[#allocation2 + $0x180] sm:$0x1] %vm222_vm3, %v5601_v1  ;;  %240 = vst.msk [vmem:[#allocation2 + $0x41] sm:$0x1] %vm222_vm3, %v5601_v1  ;;  %v263_v16 = vld [vmem:[%s5751_s13 + $0x40] sm:$0xff]  ;;  %v264_v17 = vld [vmem:[%s5751_s13 + $0x48] sm:$0xff]  ;;  %4770 = vmatpush3.msk.msra.mxu1 %vm482_vm0, %v5697_v3 }
  0x24   : > { %241 = vst.msk [vmem:[#allocation2 + $0x59] sm:$0x1] %vm222_vm3, %v5601_v1  ;;  %242 = vst.msk [vmem:[#allocation2 + $0x71] sm:$0x1] %vm222_vm3, %v5601_v1  ;;  %v265_v18 = vld [vmem:[%s5751_s13 + $0x50] sm:$0xff]  ;;  %v266_v19 = vld [vmem:[%s5751_s13 + $0x58] sm:$0xff]  ;;  %4819 = vmatprep.subr.msk.mxu1 %vm482_vm0, %v5759_v8 }
  0x25   : > { %243 = vst.msk [vmem:[#allocation2 + $0x89] sm:$0x1] %vm222_vm3, %v5601_v1  ;;  %244 = vst.msk [vmem:[#allocation2 + $0xa1] sm:$0x1] %vm222_vm3, %v5601_v1  ;;  %v267_v20 = vld [vmem:[%s5751_s13 + $0x60] sm:$0xff]  ;;  %v268_v21 = vld [vmem:[%s5751_s13 + $0x68] sm:$0xff] }
  0x26   : > { %245 = vst.msk [vmem:[#allocation2 + $0xb9] sm:$0x1] %vm222_vm3, %v5601_v1  ;;  %246 = vst.msk [vmem:[#allocation2 + $0xd1] sm:$0x1] %vm222_vm3, %v5601_v1  ;;  %v269_v22 = vld [vmem:[%s5751_s13 + $0x70] sm:$0xff]  ;;  %v270_v23 = vld [vmem:[%s5751_s13 + $0x78] sm:$0xff] }
  0x27   : > { %247 = vst.msk [vmem:[#allocation2 + $0xe9] sm:$0x1] %vm222_vm3, %v5601_v1  ;;  %248 = vst.msk [vmem:[#allocation2 + $0x101] sm:$0x1] %vm222_vm3, %v5601_v1  ;;  %v271_v24 = vld [vmem:[%s5751_s13 + $0x80] sm:$0xff]  ;;  %v272_v25 = vld [vmem:[%s5751_s13 + $0x88] sm:$0xff] }
  0x28   : > { %249 = vst.msk [vmem:[#allocation2 + $0x119] sm:$0x1] %vm222_vm3, %v5601_v1  ;;  %250 = vst.msk [vmem:[#allocation2 + $0x131] sm:$0x1] %vm222_vm3, %v5601_v1  ;;  %v273_v26 = vld [vmem:[%s5751_s13 + $0x90] sm:$0xff]  ;;  %v274_v27 = vld [vmem:[%s5751_s13 + $0x98] sm:$0xff] }
  0x29   : > { %251 = vst.msk [vmem:[#allocation2 + $0x149] sm:$0x1] %vm222_vm3, %v5601_v1  ;;  %252 = vst.msk [vmem:[#allocation2 + $0x161] sm:$0x1] %vm222_vm3, %v5601_v1  ;;  %v275_v28 = vld [vmem:[%s5751_s13 + $0xa0] sm:$0xff]  ;;  %v276_v29 = vld [vmem:[%s5751_s13 + $0xa8] sm:$0xff] }
  0x2a   : > { %253 = vst.msk [vmem:[#allocation2 + $0x179] sm:$0x1] %vm222_vm3, %v5601_v1  ;;  %254 = vst.msk [vmem:[#allocation2 + $0x191] sm:$0x1] %vm222_vm3, %v5601_v1  ;;  %v277_v38 = vld [vmem:[%s5751_s13 + $0xb0] sm:$0xff]  ;;  %v278_v39 = vld [vmem:[%s5751_s13 + $0xb8] sm:$0xff] }
  0x2b   : > { %287 = vst.msk [vmem:[#allocation2 + $0x19] sm:$0xff] %vm212_vm1, %v255_v5  ;;  %288 = vst.msk [vmem:[#allocation2 + $0x21] sm:$0xff] %vm212_vm1, %v256_v6  ;;  %v279_v40 = vld [vmem:[%s5751_s13 + $0xc0] sm:$0xff]  ;;  %v280_v42 = vld [vmem:[%s5751_s13 + $0xc8] sm:$0xff]  ;;  %s3945_s9 = sand.u32 1, %s5651_s19   ;;  %s4416_s10 = sshll.u32 %s5651_s19, 4 }
  0x2c   : > { %289 = vst.msk [vmem:[#allocation2 + $0x31] sm:$0xff] %vm212_vm1, %v257_v7  ;;  %290 = vst.msk [vmem:[#allocation2 + $0x39] sm:$0xff] %vm212_vm1, %v258_v11  ;;  %v281_v44 = vld [vmem:[%s5751_s13 + $0xd0] sm:$0xff]  ;;  %v282_v45 = vld [vmem:[%s5751_s13 + $0xd8] sm:$0xff]  ;;  %s200_s11 = scalar_lea.vmem [#allocation5], %s6702_s8  ;;  %s6713_s27 = scalar_lea.hbm %s6830_s3, %s4416_s10 }
  0x2d   : > { %291 = vst.msk [vmem:[#allocation2 + $0x49] sm:$0xff] %vm212_vm1, %v259_v12  ;;  %292 = vst.msk [vmem:[#allocation2 + $0x51] sm:$0xff] %vm212_vm1, %v260_v13  ;;  %v283_v46 = vld [vmem:[%s5751_s13 + $0xe0] sm:$0xff]  ;;  %v284_v47 = vld [vmem:[%s5751_s13 + $0xe8] sm:$0xff]  ;;  %s3976_s12 = sshll.u32 %s200_s11, 4  ;;  %s6721_s30 = scalar_lea.hbm %s6831_s4, %s4416_s10  ;;  %s6715_s12 = int_to_ptr.vmem [resolvable:$true] %s3976_s12 }
  0x2e   : > { %293 = vst.msk [vmem:[#allocation2 + $0x61] sm:$0xff] %vm212_vm1, %v261_v14  ;;  %294 = vst.msk [vmem:[#allocation2 + $0x69] sm:$0xff] %vm212_vm1, %v262_v15  ;;  %v285_v57 = vld [vmem:[%s5751_s13 + $0xf0] sm:$0xff]  ;;  %v286_v58 = vld [vmem:[%s5751_s13 + $0xf8] sm:$0xff]  ;;  %s206_s13 = scalar_lea.vmem [#allocation7], %s6702_s8  ;;  %s6725_s5 = scalar_lea.sflag [#allocation6], %s3945_s9 }
  0x2f   : > { %295 = vst.msk [vmem:[#allocation2 + $0x79] sm:$0xff] %vm212_vm1, %v263_v16  ;;  %296 = vst.msk [vmem:[#allocation2 + $0x81] sm:$0xff] %vm212_vm1, %v264_v17  ;;  %v5944_v63 = vld [vmem:[%s6828_s1 + $0x1c] sm:$0xf]  ;;  %s3989_s14 = sshll.u32 %s206_s13, 4  ;;  %s5477_s6 = scalar_lea.vmem %s6715_s12, 16  ;;  %s6723_s14 = int_to_ptr.vmem [resolvable:$true] %s3989_s14 }
  0x30   : > { %297 = vst.msk [vmem:[#allocation2 + $0x91] sm:$0xff] %vm212_vm1, %v265_v18  ;;  %298 = vst.msk [vmem:[#allocation2 + $0x99] sm:$0xff] %vm212_vm1, %v266_v19  ;;  %p5478_p11 = scmp.ne.s32.totalorder %s6715_s12, %s5477_s6  ;;  %s5602_s7 = smov [#allocation5]  }
  0x31   : > { %299 = vst.msk [vmem:[#allocation2 + $0xa9] sm:$0xff] %vm212_vm1, %v267_v20  ;;  %300 = vst.msk [vmem:[#allocation2 + $0xb1] sm:$0xff] %vm212_vm1, %v268_v21  ;;  %s5481_s22 = sshll.u32 %s5602_s7, 4  ;;  %s5482_s22 = int_to_ptr.vmem [resolvable:$false] %s5481_s22 }
  0x32   : > { %301 = vst.msk [vmem:[#allocation2 + $0xc1] sm:$0xff] %vm212_vm1, %v269_v22  ;;  %302 = vst.msk [vmem:[#allocation2 + $0xc9] sm:$0xff] %vm212_vm1, %v270_v23  ;;  %v354_v30 = vld [vmem:[#allocation2 + $0x19] sm:$0xff]  ;;  %v355_v31 = vld [vmem:[#allocation2 + $0x21] sm:$0xff]  ;;  %p5479_p12 = pnand %p5478_p11, %p5670_p5  ;;  %s5483_s23 = scalar_lea.vmem %s5482_s22, 32 }
  0x33   : > { %303 = vst.msk [vmem:[#allocation2 + $0xd9] sm:$0xff] %vm212_vm1, %v271_v24  ;;  %304 = vst.msk [vmem:[#allocation2 + $0xe1] sm:$0xff] %vm212_vm1, %v272_v25  ;;  %v5805_v32 = vld [vmem:[#allocation2 + $0x31] sm:$0xff]  ;;  %4724 = vmatprep.mubr.msk.f32.mxu1 %vm212_vm1, %v354_v30  ;;  %4921 = vmatprep.mubr.msk.f32.mxu0 %vm212_vm1, %v354_v30  ;;  %v5823_v34 = vld [vmem:[#allocation2 + $0x39] sm:$0xff]  ;;  %p5484_p0 = scmp.lt.s32.totalorder %s6715_s12, %s5482_s22  ;;  %p5485_p1 = scmp.lt.s32.totalorder %s5483_s23, %s5477_s6 }
  0x34   : > { %305 = vst.msk [vmem:[#allocation2 + $0xf1] sm:$0xff] %vm212_vm1, %v273_v26  ;;  %306 = vst.msk [vmem:[#allocation2 + $0xf9] sm:$0xff] %vm212_vm1, %v274_v27  ;;  %4725 = vmatmul.mubr.msk.f32.gmra.mrb[2].mxu1 %vm212_vm1, %v355_v31  ;;  %4922 = vmatmul.mubr.msk.f32.vlgmr.msra.gmra.mrb[0].mxu0 %vm212_vm1, %v355_v31  ;;  %v5827_v35 = vld [vmem:[#allocation2 + $0x49] sm:$0xff]  ;;  %v5839_v36 = vld [vmem:[#allocation2 + $0x51] sm:$0xff]  ;;  %p5480_p13 = pneg %p5479_p12 }
  0x35   : > { %307 = vst.msk [vmem:[#allocation2 + $0x109] sm:$0xff] %vm212_vm1, %v275_v28  ;;  %308 = vst.msk [vmem:[#allocation2 + $0x111] sm:$0xff] %vm212_vm1, %v276_v29  ;;  %4970 = vmatpush3.msk.msra.mxu0 %vm482_vm0, %v5705_v4  ;;  %4727 = vmatprep.mubr.msk.f32.mxu1 %vm212_vm1, %v5805_v32  ;;  %v5841_v37 = vld [vmem:[#allocation2 + $0x61] sm:$0xff]  ;;  %v5855_v41 = vld [vmem:[#allocation2 + $0x69] sm:$0xff]  ;;  %p5486_p2 = por %p5485_p1, %p5484_p0 }
  0x36   : > { %4924 = vmatprep.mubr.msk.f32.mxu0 %vm212_vm1, %v5805_v32  ;;  %5019 = vmatprep.subr.msk.mxu0 %vm482_vm0, %v5815_v33  ;;  %309 = vst.msk [vmem:[#allocation2 + $0x121] sm:$0xff] %vm212_vm1, %v277_v38  ;;  %310 = vst.msk [vmem:[#allocation2 + $0x129] sm:$0xff] %vm212_vm1, %v278_v39  ;;  %v5860_v43 = vld [vmem:[#allocation2 + $0x79] sm:$0xff]  ;;  %v5878_v48 = vld [vmem:[#allocation2 + $0x81] sm:$0xff] }
  0x37   : > { %311 = vst.msk [vmem:[#allocation2 + $0x139] sm:$0xff] %vm212_vm1, %v279_v40  ;;  %312 = vst.msk [vmem:[#allocation2 + $0x141] sm:$0xff] %vm212_vm1, %v280_v42  ;;  %v5881_v49 = vld [vmem:[#allocation2 + $0x91] sm:$0xff]  ;;  %v5891_v50 = vld [vmem:[#allocation2 + $0x99] sm:$0xff]  ;;  %p5487_p3 = pnand %p5486_p2, %p5480_p13 }
  0x38   : > { %4728 = vmatmul.mubr.msk.f32.gmra.mrb[4].mxu1 %vm212_vm1, %v5823_v34  ;;  %4925 = vmatmul.mubr.msk.f32.gmra.mrb[2].mxu0 %vm212_vm1, %v5823_v34  ;;  %313 = vst.msk [vmem:[#allocation2 + $0x151] sm:$0xff] %vm212_vm1, %v281_v44  ;;  %314 = vst.msk [vmem:[#allocation2 + $0x159] sm:$0xff] %vm212_vm1, %v282_v45  ;;  %v5893_v51 = vld [vmem:[#allocation2 + $0xa9] sm:$0xff]  ;;  %v5903_v52 = vld [vmem:[#allocation2 + $0xb1] sm:$0xff] }
  0x39   : > { %4730 = vmatprep.mubr.msk.f32.mxu1 %vm212_vm1, %v5827_v35  ;;  %4927 = vmatprep.mubr.msk.f32.mxu0 %vm212_vm1, %v5827_v35  ;;  %315 = vst.msk [vmem:[#allocation2 + $0x169] sm:$0xff] %vm212_vm1, %v283_v46  ;;  %316 = vst.msk [vmem:[#allocation2 + $0x171] sm:$0xff] %vm212_vm1, %v284_v47  ;;  %v5905_v53 = vld [vmem:[#allocation2 + $0xc1] sm:$0xff]  ;;  %v5915_v54 = vld [vmem:[#allocation2 + $0xc9] sm:$0xff] }
  0x3a   : > { %6878 = vst [vmem:[#allocation10_spill] sm:$0xff] %v5915_v54  ;;  %v5917_v55 = vld [vmem:[#allocation2 + $0x1a] sm:$0xff]  ;;  %317 = vst.msk [vmem:[#allocation2 + $0x181] sm:$0xff] %vm212_vm1, %v285_v57  ;;  %v5935_v60 = vld [vmem:[#allocation2 + $0x22] sm:$0xff] }
  0x3b   : > { %v5919_v56 = vld [vmem:[#allocation2 + $0xd9] sm:$0xff]  ;;  %318 = vst.msk [vmem:[#allocation2 + $0x189] sm:$0xff] %vm212_vm1, %v286_v58  ;;  %v5933_v59 = vld [vmem:[#allocation2 + $0xe1] sm:$0xff]  ;;  %v5937_v61 = vld [vmem:[#allocation2 + $0xf1] sm:$0xff] }
  0x3c   : > { %4731 = vmatmul.mubr.msk.f32.gmra.mrb[6].mxu1 %vm212_vm1, %v5839_v36  ;;  %4928 = vmatmul.mubr.msk.f32.gmra.mrb[4].mxu0 %vm212_vm1, %v5839_v36  ;;  %6879 = vst [vmem:[#allocation11_spill] sm:$0xff] %v5919_v56  ;;  %6880 = vst [vmem:[#allocation12_spill] sm:$0xff] %v5933_v59  ;;  %v5939_v62 = vld [vmem:[#allocation2 + $0x32] sm:$0xff]  ;;  %v5956_v1 = vld [vmem:[#allocation2 + $0x3a] sm:$0xff] }
  0x3d   : > { %4733 = vmatprep.mubr.msk.f32.mxu1 %vm212_vm1, %v5841_v37  ;;  %4930 = vmatprep.mubr.msk.f32.mxu0 %vm212_vm1, %v5841_v37  ;;  %6881 = vst [vmem:[#allocation13_spill] sm:$0xff] %v5937_v61  ;;  %v5954_v0 = vld [vmem:[#allocation2 + $0xf9] sm:$0xff]  ;;  %v5960_v3 = vld [vmem:[#allocation2 + $0x109] sm:$0xff]  ;;  %v5974_v5 = vld [vmem:[#allocation2 + $0x111] sm:$0xff] }
  0x3e   : > { %6882 = vst [vmem:[#allocation14_spill] sm:$0xff] %v5954_v0  ;;  %6883 = vst [vmem:[#allocation15_spill] sm:$0xff] %v5960_v3  ;;  %v5962_v4 = vld [vmem:[#allocation2 + $0x4a] sm:$0xff]  ;;  %v5976_v6 = vld [vmem:[#allocation2 + $0x52] sm:$0xff] }
  0x3f   : > { %6884 = vst [vmem:[#allocation16_spill] sm:$0xff] %v5974_v5  ;;  %v5978_v7 = vld [vmem:[#allocation2 + $0x121] sm:$0xff]  ;;  %v5990_v10 = vld [vmem:[#allocation2 + $0x129] sm:$0xff]  ;;  %v5994_v12 = vld [vmem:[#allocation2 + $0x139] sm:$0xff] }
  0x40   : > { %4734 = vmatmul.mubr.msk.f32.gmra.mrb[8].mxu1 %vm212_vm1, %v5855_v41  ;;  %4931 = vmatmul.mubr.msk.f32.gmra.mrb[6].mxu0 %vm212_vm1, %v5855_v41  ;;  %6885 = vst [vmem:[#allocation17_spill] sm:$0xff] %v5978_v7  ;;  %v5980_v9 = vld [vmem:[#allocation2 + $0x62] sm:$0xff]  ;;  %6886 = vst [vmem:[#allocation18_spill] sm:$0xff] %v5990_v10  ;;  %v5992_v11 = vld [vmem:[#allocation2 + $0x6a] sm:$0xff] }
  0x41   : > { %4736 = vmatprep.mubr.msk.f32.mxu1 %vm212_vm1, %v5860_v43  ;;  %4933 = vmatprep.mubr.msk.f32.mxu0 %vm212_vm1, %v5860_v43  ;;  %6887 = vst [vmem:[#allocation19_spill] sm:$0xff] %v5994_v12  ;;  %v5996_v13 = vld [vmem:[#allocation2 + $0x7a] sm:$0xff]  ;;  %v6008_v15 = vld [vmem:[#allocation2 + $0x82] sm:$0xff]  ;;  %v6010_v16 = vld [vmem:[#allocation2 + $0x151] sm:$0xff] }
  0x42   : > { %v6006_v14 = vld [vmem:[#allocation2 + $0x141] sm:$0xff]  ;;  %6889 = vst [vmem:[#allocation21_spill] sm:$0xff] %v6010_v16  ;;  %v6012_v17 = vld [vmem:[#allocation2 + $0x92] sm:$0xff]  ;;  %v6026_v20 = vld [vmem:[#allocation2 + $0x169] sm:$0xff] }
  0x43   : > { %6888 = vst [vmem:[#allocation20_spill] sm:$0xff] %v6006_v14  ;;  %v6022_v18 = vld [vmem:[#allocation2 + $0x159] sm:$0xff]  ;;  %6891 = vst [vmem:[#allocation23_spill] sm:$0xff] %v6026_v20  ;;  %v6028_v21 = vld [vmem:[#allocation2 + $0xaa] sm:$0xff] }
  0x44   : > { %4737 = vmatmul.mubr.msk.f32.gmra.mrb[10].mxu1 %vm212_vm1, %v5878_v48  ;;  %4934 = vmatmul.mubr.msk.f32.gmra.mrb[8].mxu0 %vm212_vm1, %v5878_v48  ;;  %6890 = vst [vmem:[#allocation22_spill] sm:$0xff] %v6022_v18  ;;  %v6024_v19 = vld [vmem:[#allocation2 + $0x9a] sm:$0xff]  ;;  %v6038_v22 = vld [vmem:[#allocation2 + $0x171] sm:$0xff]  ;;  %v6042_v25 = vld [vmem:[#allocation2 + $0xc2] sm:$0xff] }
  0x45   : > { %4739 = vmatprep.mubr.msk.f32.mxu1 %vm212_vm1, %v5881_v49  ;;  %4936 = vmatprep.mubr.msk.f32.mxu0 %vm212_vm1, %v5881_v49  ;;  %6892 = vst [vmem:[#allocation24_spill] sm:$0xff] %v6038_v22  ;;  %v6040_v23 = vld [vmem:[#allocation2 + $0xb2] sm:$0xff]  ;;  %v319_v24 = vld [vmem:[#allocation2] sm:$0xff]  ;;  %v320_v26 = vld [vmem:[#allocation2 + $0x8] sm:$0xff] }
  0x46   : > { %v6051_v27 = vld [vmem:[#allocation2 + $0xca] sm:$0xff]  ;;  %v6053_v28 = vld [vmem:[#allocation2 + $0x18] sm:$0xff]  ;;  %v6069_v31 = vld [vmem:[#allocation2 + $0x20] sm:$0xff] }
  0x47   : > { %6893 = vst [vmem:[#allocation25_spill] sm:$0xff] %v6053_v28  ;;  %v6055_v29 = vld [vmem:[#allocation2 + $0xda] sm:$0xff]  ;;  %v6063_v30 = vld [vmem:[%s6828_s1 + $0xc] sm:$0xf]  ;;  %6894 = vst [vmem:[#allocation26_spill] sm:$0xff] %v6069_v31 }
  0x48   : > { %4740 = vmatmul.mubr.msk.f32.gmra.mrb[12].mxu1 %vm212_vm1, %v5891_v50  ;;  %4937 = vmatmul.mubr.msk.f32.gmra.mrb[10].mxu0 %vm212_vm1, %v5891_v50  ;;  %v6075_v38 = vld [vmem:[#allocation2 + $0x30] sm:$0xff]  ;;  %v6091_v40 = vld [vmem:[#allocation2 + $0xfa] sm:$0xff]  ;;  %v6093_v42 = vld [vmem:[#allocation2 + $0x48] sm:$0xff] }
  0x49   : > { %4742 = vmatprep.mubr.msk.f32.mxu1 %vm212_vm1, %v5893_v51  ;;  %4939 = vmatprep.mubr.msk.f32.mxu0 %vm212_vm1, %v5893_v51  ;;  %6895 = vst [vmem:[#allocation27_spill] sm:$0xff] %v6075_v38  ;;  %v6077_v39 = vld [vmem:[#allocation2 + $0xf2] sm:$0xff]  ;;  %6897 = vst [vmem:[#allocation29_spill] sm:$0xff] %v6093_v42  ;;  %v6095_v44 = vld [vmem:[#allocation2 + $0x10a] sm:$0xff] }
  0x4a   : > { %v6105_v45 = vld [vmem:[#allocation2 + $0x50] sm:$0xff]  ;;  %v6109_v47 = vld [vmem:[#allocation2 + $0x60] sm:$0xff]  ;;  %v6121_v58 = vld [vmem:[#allocation2 + $0x68] sm:$0xff] }
  0x4b   : > { %6898 = vst [vmem:[#allocation30_spill] sm:$0xff] %v6105_v45  ;;  %v6107_v46 = vld [vmem:[#allocation2 + $0x112] sm:$0xff]  ;;  %6899 = vst [vmem:[#allocation31_spill] sm:$0xff] %v6109_v47  ;;  %v6111_v57 = vld [vmem:[#allocation2 + $0x122] sm:$0xff] }
  0x4c   : > { %4743 = vmatmul.mubr.msk.f32.gmra.mrb[14].mxu1 %vm212_vm1, %v5903_v52  ;;  %4940 = vmatmul.mubr.msk.f32.gmra.mrb[12].mxu0 %vm212_vm1, %v5903_v52  ;;  %6900 = vst [vmem:[#allocation32_spill] sm:$0xff] %v6121_v58 }
  0x4d   : > { %4745 = vmatprep.mubr.msk.f32.mxu1 %vm212_vm1, %v5905_v53  ;;  %4942 = vmatprep.mubr.msk.f32.mxu0 %vm212_vm1, %v5905_v53 }
  0x50   : > { %4746 = vmatmul.mubr.msk.f32.gmra.mrb[16].mxu1 %vm212_vm1, %v5915_v54  ;;  %4943 = vmatmul.mubr.msk.f32.gmra.mrb[14].mxu0 %vm212_vm1, %v5915_v54  ;;  %v6199_v54 = vld [vmem:[#allocation2 + $0xe0] sm:$0xff] }
  0x51   : > { %4748 = vmatprep.mubr.msk.f32.mxu1 %vm212_vm1, %v5919_v56  ;;  %4971 = vmatprep.mubr.msk.f32.mxu0 %vm212_vm1, %v5917_v55  ;;  %v6187_v56 = vld [vmem:[#allocation2 + $0x18a] sm:$0xff] }
  0x52   : > { %6908 = vst [vmem:[#allocation40_spill] sm:$0xff] %v6187_v56 }
  0x54   : > { %4749 = vmatmul.mubr.msk.f32.gmra.mrb[18].mxu1 %vm212_vm1, %v5933_v59  ;;  %4972 = vmatmul.mubr.msk.f32.vlgmr.msra.gmra.mrb[0].mxu0 %vm212_vm1, %v5935_v60  ;;  %v6175_v59 = vld [vmem:[#allocation2 + $0x182] sm:$0xff] }
  0x55   : > { %5020 = vmatpush3.msk.msra.mxu0 %vm482_vm0, %v5815_v33  ;;  %4751 = vmatprep.mubr.msk.f32.mxu1 %vm212_vm1, %v5937_v61  ;;  %v6071_v33 = vld [vmem:[#allocation2 + $0xe2] sm:$0xff]  ;;  %6907 = vst [vmem:[#allocation39_spill] sm:$0xff] %v6175_v59 }
  0x56   : > { %4974 = vmatprep.mubr.msk.f32.mxu0 %vm212_vm1, %v5939_v62  ;;  %5069 = vmatprep.subr.msk.mxu0 %vm482_vm0, %v5944_v63  ;;  %v6173_v61 = vld [vmem:[#allocation2 + $0xc0] sm:$0xff] }
  0x58   : > { %4752 = vmatmul.mubr.msk.f32.gmra.mrb[20].mxu1 %vm212_vm1, %v5954_v0  ;;  %4975 = vmatmul.mubr.msk.f32.gmra.mrb[2].mxu0 %vm212_vm1, %v5956_v1  ;;  %v6171_v0 = vld [vmem:[#allocation2 + $0x172] sm:$0xff] }
  0x59   : > { %4754 = vmatprep.mubr.msk.f32.mxu1 %vm212_vm1, %v5960_v3  ;;  %4977 = vmatprep.mubr.msk.f32.mxu0 %vm212_vm1, %v5962_v4  ;;  %v6169_v3 = vld [vmem:[#allocation2 + $0xb0] sm:$0xff]  ;;  %6906 = vst [vmem:[#allocation38_spill] sm:$0xff] %v6171_v0 }
  0x5a   : > { %6905 = vst [vmem:[#allocation37_spill] sm:$0xff] %v6169_v3 }
  0x5c   : > { %4755 = vmatmul.mubr.msk.f32.gmra.mrb[22].mxu1 %vm212_vm1, %v5974_v5  ;;  %4978 = vmatmul.mubr.msk.f32.gmra.mrb[4].mxu0 %vm212_vm1, %v5976_v6  ;;  %v6159_v5 = vld [vmem:[#allocation2 + $0x16a] sm:$0xff] }
  0x5d   : > { %4757 = vmatprep.mubr.msk.f32.mxu1 %vm212_vm1, %v5978_v7  ;;  %4980 = vmatprep.mubr.msk.f32.mxu0 %vm212_vm1, %v5980_v9  ;;  %v6157_v7 = vld [vmem:[#allocation2 + $0xa8] sm:$0xff] }
  0x60   : > { %4758 = vmatmul.mubr.msk.f32.gmra.mrb[24].mxu1 %vm212_vm1, %v5990_v10  ;;  %4981 = vmatmul.mubr.msk.f32.gmra.mrb[6].mxu0 %vm212_vm1, %v5992_v11  ;;  %v6155_v10 = vld [vmem:[#allocation2 + $0x15a] sm:$0xff] }
  0x61   : > { %4760 = vmatprep.mubr.msk.f32.mxu1 %vm212_vm1, %v5994_v12  ;;  %4983 = vmatprep.mubr.msk.f32.mxu0 %vm212_vm1, %v5996_v13  ;;  %v6153_v12 = vld [vmem:[#allocation2 + $0x98] sm:$0xff] }
  0x62   : > { %6904 = vst [vmem:[#allocation36_spill] sm:$0xff] %v6153_v12 }
  0x64   : > { %4761 = vmatmul.mubr.msk.f32.gmra.mrb[26].mxu1 %vm212_vm1, %v6006_v14  ;;  %4984 = vmatmul.mubr.msk.f32.gmra.mrb[8].mxu0 %vm212_vm1, %v6008_v15  ;;  %v6143_v14 = vld [vmem:[#allocation2 + $0x152] sm:$0xff] }
  0x65   : > { %4763 = vmatprep.mubr.msk.f32.mxu1 %vm212_vm1, %v6010_v16  ;;  %4986 = vmatprep.mubr.msk.f32.mxu0 %vm212_vm1, %v6012_v17  ;;  %v6141_v16 = vld [vmem:[#allocation2 + $0x90] sm:$0xff] }
  0x66   : > { %6903 = vst [vmem:[#allocation35_spill] sm:$0xff] %v6141_v16 }
  0x68   : > { %4764 = vmatmul.mubr.msk.f32.gmra.mrb[28].mxu1 %vm212_vm1, %v6022_v18  ;;  %4987 = vmatmul.mubr.msk.f32.gmra.mrb[10].mxu0 %vm212_vm1, %v6024_v19  ;;  %v6139_v18 = vld [vmem:[#allocation2 + $0x142] sm:$0xff] }
  0x69   : > { %4766 = vmatprep.mubr.msk.f32.mxu1 %vm212_vm1, %v6026_v20  ;;  %4989 = vmatprep.mubr.msk.f32.mxu0 %vm212_vm1, %v6028_v21  ;;  %v6137_v20 = vld [vmem:[#allocation2 + $0x80] sm:$0xff] }
  0x6a   : > { %6902 = vst [vmem:[#allocation34_spill] sm:$0xff] %v6137_v20 }
  0x6c   : > { %4767 = vmatmul.mubr.msk.f32.gmra.mrb[30].mxu1 %vm212_vm1, %v6038_v22  ;;  %4990 = vmatmul.mubr.msk.f32.gmra.mrb[12].mxu0 %vm212_vm1, %v6040_v23  ;;  %v6127_v22 = vld [vmem:[#allocation2 + $0x13a] sm:$0xff] }
  0x6d   : > { %4771 = vmatprep.mubr.msk.f32.mxu1 %vm212_vm1, %v319_v24  ;;  %4992 = vmatprep.mubr.msk.f32.mxu0 %vm212_vm1, %v6042_v25  ;;  %v6123_v24 = vld [vmem:[#allocation2 + $0x12a] sm:$0xff] }
  0x70   : > { %4772 = vmatmul.mubr.msk.f32.vlgmr.msra.gmra.mrb[0].mxu1 %vm212_vm1, %v320_v26  ;;  %4993 = vmatmul.mubr.msk.f32.gmra.mrb[14].mxu0 %vm212_vm1, %v6051_v27  ;;  %v6125_v26 = vld [vmem:[#allocation2 + $0x78] sm:$0xff] }
  0x71   : > { %4774 = vmatprep.mubr.msk.f32.mxu1 %vm212_vm1, %v6053_v28  ;;  %4995 = vmatprep.mubr.msk.f32.mxu0 %vm212_vm1, %v6055_v29  ;;  %6901 = vst [vmem:[#allocation33_spill] sm:$0xff] %v6125_v26  ;;  %v6189_v28 = vld [vmem:[#allocation2 + $0xd8] sm:$0xff] }
  0x72   : > { %4820 = vmatpush3.msk.msra.mxu1 %vm482_vm0, %v5759_v8  ;;  %v6089_v8 = vld [vmem:[#allocation2 + $0x38] sm:$0xff] }
  0x73   : > { %4869 = vmatprep.subr.msk.mxu1 %vm482_vm0, %v6063_v30  ;;  %6896 = vst [vmem:[#allocation28_spill] sm:$0xff] %v6089_v8 }
  0x74   : > { %4775 = vmatmul.mubr.msk.f32.gmra.mrb[2].mxu1 %vm212_vm1, %v6069_v31  ;;  %4996 = vmatmul.mubr.msk.f32.gmra.mrb[16].mxu0 %vm212_vm1, %v6071_v33  ;;  %v6185_v31 = vld [vmem:[#allocation2 + $0xc8] sm:$0xff] }
  0x75   : > { %4777 = vmatprep.mubr.msk.f32.mxu1 %vm212_vm1, %v6075_v38  ;;  %4998 = vmatprep.mubr.msk.f32.mxu0 %vm212_vm1, %v6077_v39 }
  0x78   : > { %4778 = vmatmul.mubr.msk.f32.gmra.mrb[4].mxu1 %vm212_vm1, %v6089_v8  ;;  %4999 = vmatmul.mubr.msk.f32.gmra.mrb[18].mxu0 %vm212_vm1, %v6091_v40 }
  0x79   : > { %4780 = vmatprep.mubr.msk.f32.mxu1 %vm212_vm1, %v6093_v42  ;;  %5001 = vmatprep.mubr.msk.f32.mxu0 %vm212_vm1, %v6095_v44 }
  0x7c   : > { %4781 = vmatmul.mubr.msk.f32.gmra.mrb[6].mxu1 %vm212_vm1, %v6105_v45  ;;  %5002 = vmatmul.mubr.msk.f32.gmra.mrb[20].mxu0 %vm212_vm1, %v6107_v46 }
  0x7d   : > { %4783 = vmatprep.mubr.msk.f32.mxu1 %vm212_vm1, %v6109_v47  ;;  %5004 = vmatprep.mubr.msk.f32.mxu0 %vm212_vm1, %v6111_v57 }
  0x80   : > { %4784 = vmatmul.mubr.msk.f32.gmra.mrb[8].mxu1 %vm212_vm1, %v6121_v58  ;;  %5005 = vmatmul.mubr.msk.f32.gmra.mrb[22].mxu0 %vm212_vm1, %v6123_v24 }
  0x81   : > { %4786 = vmatprep.mubr.msk.f32.mxu1 %vm212_vm1, %v6125_v26  ;;  %5007 = vmatprep.mubr.msk.f32.mxu0 %vm212_vm1, %v6127_v22 }
  0x84   : > { %4787 = vmatmul.mubr.msk.f32.gmra.mrb[10].mxu1 %vm212_vm1, %v6137_v20  ;;  %5008 = vmatmul.mubr.msk.f32.gmra.mrb[24].mxu0 %vm212_vm1, %v6139_v18 }
  0x85   : > { %4789 = vmatprep.mubr.msk.f32.mxu1 %vm212_vm1, %v6141_v16  ;;  %5010 = vmatprep.mubr.msk.f32.mxu0 %vm212_vm1, %v6143_v14 }
  0x88   : > { %4790 = vmatmul.mubr.msk.f32.gmra.mrb[12].mxu1 %vm212_vm1, %v6153_v12  ;;  %5011 = vmatmul.mubr.msk.f32.gmra.mrb[26].mxu0 %vm212_vm1, %v6155_v10 }
  0x89   : > { %4792 = vmatprep.mubr.msk.f32.mxu1 %vm212_vm1, %v6157_v7  ;;  %5013 = vmatprep.mubr.msk.f32.mxu0 %vm212_vm1, %v6159_v5 }
  0x8c   : > { %4793 = vmatmul.mubr.msk.f32.gmra.mrb[14].mxu1 %vm212_vm1, %v6169_v3  ;;  %5014 = vmatmul.mubr.msk.f32.gmra.mrb[28].mxu0 %vm212_vm1, %v6171_v0  ;;  %v6206_v0 = vld [vmem:[%s6828_s1 + $0x20] sm:$0xf] }
  0x8d   : > { %4795 = vmatprep.mubr.msk.f32.mxu1 %vm212_vm1, %v6173_v61  ;;  %5016 = vmatprep.mubr.msk.f32.mxu0 %vm212_vm1, %v6175_v59  ;;  %v6201_v59 = vld [vmem:[#allocation2 + $0xf0] sm:$0xff] }
  0x90   : > { %4796 = vmatmul.mubr.msk.f32.gmra.mrb[16].mxu1 %vm212_vm1, %v6185_v31  ;;  %5017 = vmatmul.mubr.msk.f32.gmra.mrb[30].mxu0 %vm212_vm1, %v6187_v56  ;;  %v6216_v56 = vld [vmem:[#allocation2 + $0xf8] sm:$0xff] }
  0x91   : > { %4798 = vmatprep.mubr.msk.f32.mxu1 %vm212_vm1, %v6189_v28  ;;  %5021 = vmatprep.mubr.msk.f32.mxu0 %vm212_vm1, %v6075_v38  ;;  %v6220_v38 = vld [vmem:[#allocation2 + $0x108] sm:$0xff] }
  0x94   : > { %4799 = vmatmul.mubr.msk.f32.gmra.mrb[18].mxu1 %vm212_vm1, %v6199_v54  ;;  %5022 = vmatmul.mubr.msk.f32.vlgmr.msra.gmra.mrb[0].mxu0 %vm212_vm1, %v6089_v8  ;;  %v6246_v8 = vld [vmem:[#allocation2 + $0x138] sm:$0xff] }
  0x95   : > { %5070 = vmatpush3.msk.msra.mxu0 %vm482_vm0, %v5944_v63  ;;  %4801 = vmatprep.mubr.msk.f32.mxu1 %vm212_vm1, %v6201_v59  ;;  %v6232_v63 = vld [vmem:[#allocation2 + $0x110] sm:$0xff] }
  0x96   : > { %5024 = vmatprep.mubr.msk.f32.mxu0 %vm212_vm1, %v6093_v42  ;;  %5119 = vmatprep.subr.msk.mxu0 %vm482_vm0, %v6206_v0  ;;  %v6234_v42 = vld [vmem:[#allocation2 + $0x120] sm:$0xff] }
  0x98   : > { %4802 = vmatmul.mubr.msk.f32.gmra.mrb[20].mxu1 %vm212_vm1, %v6216_v56  ;;  %5025 = vmatmul.mubr.msk.f32.gmra.mrb[2].mxu0 %vm212_vm1, %v6105_v45  ;;  %v6244_v45 = vld [vmem:[#allocation2 + $0x128] sm:$0xff] }
  0x99   : > { %4804 = vmatprep.mubr.msk.f32.mxu1 %vm212_vm1, %v6220_v38  ;;  %5027 = vmatprep.mubr.msk.f32.mxu0 %vm212_vm1, %v6109_v47  ;;  %v6258_v47 = vld [vmem:[#allocation2 + $0x150] sm:$0xff] }
  0x9c   : > { %4805 = vmatmul.mubr.msk.f32.gmra.mrb[22].mxu1 %vm212_vm1, %v6232_v63  ;;  %5028 = vmatmul.mubr.msk.f32.gmra.mrb[4].mxu0 %vm212_vm1, %v6121_v58  ;;  %v6256_v58 = vld [vmem:[#allocation2 + $0x140] sm:$0xff] }
  0x9d   : > { %4807 = vmatprep.mubr.msk.f32.mxu1 %vm212_vm1, %v6234_v42  ;;  %5030 = vmatprep.mubr.msk.f32.mxu0 %vm212_vm1, %v6125_v26  ;;  %v6270_v26 = vld [vmem:[#allocation2 + $0x168] sm:$0xff] }
  0xa0   : > { %4808 = vmatmul.mubr.msk.f32.gmra.mrb[24].mxu1 %vm212_vm1, %v6244_v45  ;;  %5031 = vmatmul.mubr.msk.f32.gmra.mrb[6].mxu0 %vm212_vm1, %v6137_v20  ;;  %v6268_v20 = vld [vmem:[#allocation2 + $0x158] sm:$0xff] }
  0xa1   : > { %4810 = vmatprep.mubr.msk.f32.mxu1 %vm212_vm1, %v6246_v8  ;;  %5033 = vmatprep.mubr.msk.f32.mxu0 %vm212_vm1, %v6141_v16  ;;  %v1035_v16 = vld [vmem:[#allocation2 + $0x2] sm:$0xff] }
  0xa4   : > { %4811 = vmatmul.mubr.msk.f32.gmra.mrb[26].mxu1 %vm212_vm1, %v6256_v58  ;;  %5034 = vmatmul.mubr.msk.f32.gmra.mrb[8].mxu0 %vm212_vm1, %v6153_v12  ;;  %v6280_v12 = vld [vmem:[#allocation2 + $0x170] sm:$0xff] }
  0xa5   : > { %4813 = vmatprep.mubr.msk.f32.mxu1 %vm212_vm1, %v6258_v47  ;;  %5036 = vmatprep.mubr.msk.f32.mxu0 %vm212_vm1, %v6157_v7 }
  0xa8   : > { %4814 = vmatmul.mubr.msk.f32.gmra.mrb[28].mxu1 %vm212_vm1, %v6268_v20  ;;  %5037 = vmatmul.mubr.msk.f32.gmra.mrb[10].mxu0 %vm212_vm1, %v6169_v3  ;;  %v1036_v3 = vld [vmem:[#allocation2 + $0xa] sm:$0xff] }
  0xa9   : > { %4816 = vmatprep.mubr.msk.f32.mxu1 %vm212_vm1, %v6270_v26  ;;  %5039 = vmatprep.mubr.msk.f32.mxu0 %vm212_vm1, %v6173_v61 }
  0xac   : > { %4817 = vmatmul.mubr.msk.f32.gmra.mrb[30].mxu1 %vm212_vm1, %v6280_v12  ;;  %5040 = vmatmul.mubr.msk.f32.gmra.mrb[12].mxu0 %vm212_vm1, %v6185_v31 }
  0xad   : > { %4821 = vmatprep.mubr.msk.f32.mxu1 %vm212_vm1, %v1035_v16  ;;  %5042 = vmatprep.mubr.msk.f32.mxu0 %vm212_vm1, %v6189_v28  ;;  %v2627_v16 = vld [vmem:[#allocation2 + $0x1a0] sm:$0xff] }
  0xb0   : > { %4822 = vmatmul.mubr.msk.f32.vlgmr.msra.gmra.mrb[0].mxu1 %vm212_vm1, %v1036_v3  ;;  %5043 = vmatmul.mubr.msk.f32.gmra.mrb[14].mxu0 %vm212_vm1, %v6199_v54  ;;  %v2626_v3 = vld [vmem:[#allocation2 + $0x198] sm:$0xff] }
  0xb1   : > { %4824 = vmatprep.mubr.msk.f32.mxu1 %vm212_vm1, %v5917_v55  ;;  %5045 = vmatprep.mubr.msk.f32.mxu0 %vm212_vm1, %v6201_v59  ;;  %v6340_v55 = vld [vmem:[#allocation2 + $0x180] sm:$0xff] }
  0xb2   : > { %4870 = vmatpush3.msk.msra.mxu1 %vm482_vm0, %v6063_v30  ;;  %v6923_v30 = vld [vmem:[#allocation31_spill] sm:$0xff] }
  0xb3   : > { %5169 = vmatprep.subr.msk.mxu1 %vm482_vm0, %v5691_v2 }
  0xb4   : > { %4825 = vmatmul.mubr.msk.f32.gmra.mrb[2].mxu1 %vm212_vm1, %v5935_v60  ;;  %5046 = vmatmul.mubr.msk.f32.gmra.mrb[16].mxu0 %vm212_vm1, %v6216_v56  ;;  %v6350_v60 = vld [vmem:[#allocation2 + $0x188] sm:$0xff] }
  0xb5   : > { %4827 = vmatprep.mubr.msk.f32.mxu1 %vm212_vm1, %v5939_v62  ;;  %5048 = vmatprep.mubr.msk.f32.mxu0 %vm212_vm1, %v6220_v38 }
  0xb8   : > { %4828 = vmatmul.mubr.msk.f32.gmra.mrb[4].mxu1 %vm212_vm1, %v5956_v1  ;;  %5049 = vmatmul.mubr.msk.f32.gmra.mrb[18].mxu0 %vm212_vm1, %v6232_v63 }
  0xb9   : > { %4830 = vmatprep.mubr.msk.f32.mxu1 %vm212_vm1, %v5962_v4  ;;  %5051 = vmatprep.mubr.msk.f32.mxu0 %vm212_vm1, %v6234_v42 }
  0xbc   : > { %4831 = vmatmul.mubr.msk.f32.gmra.mrb[6].mxu1 %vm212_vm1, %v5976_v6  ;;  %5052 = vmatmul.mubr.msk.f32.gmra.mrb[20].mxu0 %vm212_vm1, %v6244_v45 }
  0xbd   : > { %4833 = vmatprep.mubr.msk.f32.mxu1 %vm212_vm1, %v5980_v9  ;;  %5054 = vmatprep.mubr.msk.f32.mxu0 %vm212_vm1, %v6246_v8 }
  0xc0   : > { %4834 = vmatmul.mubr.msk.f32.gmra.mrb[8].mxu1 %vm212_vm1, %v5992_v11  ;;  %5055 = vmatmul.mubr.msk.f32.gmra.mrb[22].mxu0 %vm212_vm1, %v6256_v58 }
  0xc1   : > { %4836 = vmatprep.mubr.msk.f32.mxu1 %vm212_vm1, %v5996_v13  ;;  %5057 = vmatprep.mubr.msk.f32.mxu0 %vm212_vm1, %v6258_v47 }
  0xc4   : > { %4837 = vmatmul.mubr.msk.f32.gmra.mrb[10].mxu1 %vm212_vm1, %v6008_v15  ;;  %5058 = vmatmul.mubr.msk.f32.gmra.mrb[24].mxu0 %vm212_vm1, %v6268_v20 }
  0xc5   : > { %4839 = vmatprep.mubr.msk.f32.mxu1 %vm212_vm1, %v6012_v17  ;;  %5060 = vmatprep.mubr.msk.f32.mxu0 %vm212_vm1, %v6270_v26 }
  0xc8   : > { %4840 = vmatmul.mubr.msk.f32.gmra.mrb[12].mxu1 %vm212_vm1, %v6024_v19  ;;  %5061 = vmatmul.mubr.msk.f32.gmra.mrb[26].mxu0 %vm212_vm1, %v6280_v12 }
  0xc9   : > { %4842 = vmatprep.mubr.msk.f32.mxu1 %vm212_vm1, %v6028_v21  ;;  %5063 = vmatprep.mubr.msk.f32.mxu0 %vm212_vm1, %v6340_v55 }
  0xcc   : > { %4843 = vmatmul.mubr.msk.f32.gmra.mrb[14].mxu1 %vm212_vm1, %v6040_v23  ;;  %5064 = vmatmul.mubr.msk.f32.gmra.mrb[28].mxu0 %vm212_vm1, %v6350_v60 }
  0xcd   : > { %4845 = vmatprep.mubr.msk.f32.mxu1 %vm212_vm1, %v6042_v25  ;;  %5066 = vmatprep.mubr.msk.f32.mxu0 %vm212_vm1, %v2626_v3  ;;  %v6925_v3 = vld [vmem:[#allocation32_spill] sm:$0xff] }
  0xd0   : > { %4846 = vmatmul.mubr.msk.f32.gmra.mrb[16].mxu1 %vm212_vm1, %v6051_v27  ;;  %5067 = vmatmul.mubr.msk.f32.gmra.mrb[30].mxu0 %vm212_vm1, %v2627_v16  ;;  %v6926_v16 = vld [vmem:[#allocation18_spill] sm:$0xff] }
  0xd1   : > { %4848 = vmatprep.mubr.msk.f32.mxu1 %vm212_vm1, %v6055_v29  ;;  %5071 = vmatprep.mubr.msk.f32.mxu0 %vm212_vm1, %v5805_v32  ;;  %v6909_v32 = vld [vmem:[#allocation38_spill] sm:$0xff] }
  0xd4   : > { %4849 = vmatmul.mubr.msk.f32.gmra.mrb[18].mxu1 %vm212_vm1, %v6071_v33  ;;  %5072 = vmatmul.mubr.msk.f32.vlgmr.msra.gmra.mrb[0].mxu0 %vm212_vm1, %v5823_v34  ;;  %v6910_v34 = vld [vmem:[#allocation10_spill] sm:$0xff] }
  0xd5   : > { %5120 = vmatpush3.msk.msra.mxu0 %vm482_vm0, %v6206_v0  ;;  %4851 = vmatprep.mubr.msk.f32.mxu1 %vm212_vm1, %v6077_v39  ;;  %v6922_v0 = vld [vmem:[#allocation16_spill] sm:$0xff] }
  0xd6   : > { %5074 = vmatprep.mubr.msk.f32.mxu0 %vm212_vm1, %v5827_v35  ;;  %v6911_v35 = vld [vmem:[#allocation25_spill] sm:$0xff] }
  0xd8   : > { %4852 = vmatmul.mubr.msk.f32.gmra.mrb[20].mxu1 %vm212_vm1, %v6091_v40  ;;  %5075 = vmatmul.mubr.msk.f32.gmra.mrb[2].mxu0 %vm212_vm1, %v5839_v36  ;;  %v6912_v36 = vld [vmem:[#allocation11_spill] sm:$0xff] }
  0xd9   : > { %4854 = vmatprep.mubr.msk.f32.mxu1 %vm212_vm1, %v6095_v44  ;;  %5077 = vmatprep.mubr.msk.f32.mxu0 %vm212_vm1, %v5841_v37  ;;  %v6913_v37 = vld [vmem:[#allocation26_spill] sm:$0xff] }
  0xdc   : > { %4855 = vmatmul.mubr.msk.f32.gmra.mrb[22].mxu1 %vm212_vm1, %v6107_v46  ;;  %5078 = vmatmul.mubr.msk.f32.gmra.mrb[4].mxu0 %vm212_vm1, %v5855_v41  ;;  %v6914_v41 = vld [vmem:[#allocation12_spill] sm:$0xff] }
  0xdd   : > { %4857 = vmatprep.mubr.msk.f32.mxu1 %vm212_vm1, %v6111_v57  ;;  %5080 = vmatprep.mubr.msk.f32.mxu0 %vm212_vm1, %v5860_v43  ;;  %v6915_v43 = vld [vmem:[#allocation27_spill] sm:$0xff] }
  0xe0   : > { %4858 = vmatmul.mubr.msk.f32.gmra.mrb[24].mxu1 %vm212_vm1, %v6123_v24  ;;  %5081 = vmatmul.mubr.msk.f32.gmra.mrb[6].mxu0 %vm212_vm1, %v5878_v48  ;;  %v6916_v48 = vld [vmem:[#allocation13_spill] sm:$0xff] }
  0xe1   : > { %4860 = vmatprep.mubr.msk.f32.mxu1 %vm212_vm1, %v6127_v22  ;;  %5083 = vmatprep.mubr.msk.f32.mxu0 %vm212_vm1, %v5881_v49  ;;  %v6917_v49 = vld [vmem:[#allocation28_spill] sm:$0xff] }
  0xe4   : > { %4861 = vmatmul.mubr.msk.f32.gmra.mrb[26].mxu1 %vm212_vm1, %v6139_v18  ;;  %5084 = vmatmul.mubr.msk.f32.gmra.mrb[8].mxu0 %vm212_vm1, %v5891_v50  ;;  %v6918_v50 = vld [vmem:[#allocation14_spill] sm:$0xff] }
  0xe5   : > { %4863 = vmatprep.mubr.msk.f32.mxu1 %vm212_vm1, %v6143_v14  ;;  %5086 = vmatprep.mubr.msk.f32.mxu0 %vm212_vm1, %v5893_v51  ;;  %v6919_v51 = vld [vmem:[#allocation29_spill] sm:$0xff] }
  0xe8   : > { %4864 = vmatmul.mubr.msk.f32.gmra.mrb[28].mxu1 %vm212_vm1, %v6155_v10  ;;  %5087 = vmatmul.mubr.msk.f32.gmra.mrb[10].mxu0 %vm212_vm1, %v5903_v52  ;;  %v6920_v52 = vld [vmem:[#allocation15_spill] sm:$0xff] }
  0xe9   : > { %4866 = vmatprep.mubr.msk.f32.mxu1 %vm212_vm1, %v6159_v5  ;;  %5089 = vmatprep.mubr.msk.f32.mxu0 %vm212_vm1, %v5905_v53  ;;  %v6921_v53 = vld [vmem:[#allocation30_spill] sm:$0xff] }
  0xec   : > { %4867 = vmatmul.mubr.msk.f32.gmra.mrb[30].mxu1 %vm212_vm1, %v6909_v32  ;;  %5090 = vmatmul.mubr.msk.f32.gmra.mrb[12].mxu0 %vm212_vm1, %v6910_v34  ;;  %v6927_v34 = vld [vmem:[#allocation33_spill] sm:$0xff] }
  0xed   : > { %4871 = vmatprep.mubr.msk.f32.mxu1 %vm212_vm1, %v6911_v35  ;;  %5092 = vmatprep.mubr.msk.f32.mxu0 %vm212_vm1, %v6912_v36  ;;  %v6928_v35 = vld [vmem:[#allocation19_spill] sm:$0xff]  ;;  %v6929_v36 = vld [vmem:[#allocation34_spill] sm:$0xff] }
  0xf0   : > { %4872 = vmatmul.mubr.msk.f32.vlgmr.msra.gmra.mrb[0].mxu1 %vm212_vm1, %v6913_v37  ;;  %5093 = vmatmul.mubr.msk.f32.gmra.mrb[14].mxu0 %vm212_vm1, %v6914_v41  ;;  %v6930_v37 = vld [vmem:[#allocation20_spill] sm:$0xff]  ;;  %v6931_v41 = vld [vmem:[#allocation35_spill] sm:$0xff] }
  0xf1   : > { %4874 = vmatprep.mubr.msk.f32.mxu1 %vm212_vm1, %v6915_v43  ;;  %5095 = vmatprep.mubr.msk.f32.mxu0 %vm212_vm1, %v6916_v48  ;;  %v6932_v43 = vld [vmem:[#allocation21_spill] sm:$0xff] }
  0xf2   : > { %5170 = vmatpush3.msk.msra.mxu1 %vm482_vm0, %v5691_v2  ;;  %v6924_v2 = vld [vmem:[#allocation17_spill] sm:$0xff] }
  0xf4   : > { %4875 = vmatmul.mubr.msk.f32.gmra.mrb[2].mxu1 %vm212_vm1, %v6917_v49  ;;  %5096 = vmatmul.mubr.msk.f32.gmra.mrb[16].mxu0 %vm212_vm1, %v6918_v50  ;;  %v6933_v49 = vld [vmem:[#allocation36_spill] sm:$0xff] }
  0xf5   : > { %4877 = vmatprep.mubr.msk.f32.mxu1 %vm212_vm1, %v6919_v51  ;;  %5098 = vmatprep.mubr.msk.f32.mxu0 %vm212_vm1, %v6920_v52  ;;  %v6934_v51 = vld [vmem:[#allocation22_spill] sm:$0xff] }
  0xf8   : > { %4878 = vmatmul.mubr.msk.f32.gmra.mrb[4].mxu1 %vm212_vm1, %v6921_v53  ;;  %5099 = vmatmul.mubr.msk.f32.gmra.mrb[18].mxu0 %vm212_vm1, %v6922_v0  ;;  %v6935_v53 = vld [vmem:[#allocation23_spill] sm:$0xff] }
  0xf9   : > { %4880 = vmatprep.mubr.msk.f32.mxu1 %vm212_vm1, %v6923_v30  ;;  %5101 = vmatprep.mubr.msk.f32.mxu0 %vm212_vm1, %v6924_v2  ;;  %v6474_v30 = vld [vmem:[#allocation2 + $0x181] sm:$0xff] }
  0xfc   : > { %4881 = vmatmul.mubr.msk.f32.gmra.mrb[6].mxu1 %vm212_vm1, %v6925_v3  ;;  %5102 = vmatmul.mubr.msk.f32.gmra.mrb[20].mxu0 %vm212_vm1, %v6926_v16  ;;  %v6936_v3 = vld [vmem:[#allocation37_spill] sm:$0xff] }
  0xfd   : > { %4883 = vmatprep.mubr.msk.f32.mxu1 %vm212_vm1, %v6927_v34  ;;  %5104 = vmatprep.mubr.msk.f32.mxu0 %vm212_vm1, %v6928_v35  ;;  %v6937_v34 = vld [vmem:[#allocation24_spill] sm:$0xff] }
 0x100   : > { %4884 = vmatmul.mubr.msk.f32.gmra.mrb[8].mxu1 %vm212_vm1, %v6929_v36  ;;  %5105 = vmatmul.mubr.msk.f32.gmra.mrb[22].mxu0 %vm212_vm1, %v6930_v37  ;;  %v6484_v36 = vld [vmem:[#allocation2 + $0x189] sm:$0xff] }
 0x101   : > { %4886 = vmatprep.mubr.msk.f32.mxu1 %vm212_vm1, %v6931_v41  ;;  %5107 = vmatprep.mubr.msk.f32.mxu0 %vm212_vm1, %v6932_v43  ;;  %v3017_v41 = vld [vmem:[#allocation2 + $0x1a1] sm:$0xff] }
 0x104   : > { %4887 = vmatmul.mubr.msk.f32.gmra.mrb[10].mxu1 %vm212_vm1, %v6933_v49  ;;  %5108 = vmatmul.mubr.msk.f32.gmra.mrb[24].mxu0 %vm212_vm1, %v6934_v51 }
 0x105   : > { %4889 = vmatprep.mubr.msk.f32.mxu1 %vm212_vm1, %v6157_v7  ;;  %5110 = vmatprep.mubr.msk.f32.mxu0 %vm212_vm1, %v6935_v53  ;;  %v3016_v7 = vld [vmem:[#allocation2 + $0x199] sm:$0xff] }
 0x108   : > { %4890 = vmatmul.mubr.msk.f32.gmra.mrb[12].mxu1 %vm212_vm1, %v6936_v3  ;;  %5111 = vmatmul.mubr.msk.f32.gmra.mrb[26].mxu0 %vm212_vm1, %v6937_v34 }
 0x109   : > { %4892 = vmatprep.mubr.msk.f32.mxu1 %vm212_vm1, %v6173_v61  ;;  %5113 = vmatprep.mubr.msk.f32.mxu0 %vm212_vm1, %v6474_v30  ;;  %v3406_v61 = vld [vmem:[#allocation2 + $0x19a] sm:$0xff] }
 0x10c   : > { %4893 = vmatmul.mubr.msk.f32.gmra.mrb[14].mxu1 %vm212_vm1, %v6185_v31  ;;  %5114 = vmatmul.mubr.msk.f32.gmra.mrb[28].mxu0 %vm212_vm1, %v6484_v36 }
 0x10d   : > { %4895 = vmatprep.mubr.msk.f32.mxu1 %vm212_vm1, %v6189_v28  ;;  %5116 = vmatprep.mubr.msk.f32.mxu0 %vm212_vm1, %v3016_v7 }
 0x110   : > { %4896 = vmatmul.mubr.msk.f32.gmra.mrb[16].mxu1 %vm212_vm1, %v6199_v54  ;;  %5117 = vmatmul.mubr.msk.f32.gmra.mrb[30].mxu0 %vm212_vm1, %v3017_v41  ;;  %v1831_v54 = vld [vmem:[#allocation2 + $0xd9] sm:$0xff] }
 0x111   : > { %4898 = vmatprep.mubr.msk.f32.mxu1 %vm212_vm1, %v6201_v59  ;;  %5121 = vmatprep.mubr.msk.f32.mxu0 %vm212_vm1, %v5939_v62  ;;  %v6938_v59 = vld [vmem:[#allocation39_spill] sm:$0xff]  ;;  %v6939_v62 = vld [vmem:[#allocation40_spill] sm:$0xff] }
 0x114   : > { %4899 = vmatmul.mubr.msk.f32.gmra.mrb[18].mxu1 %vm212_vm1, %v6216_v56  ;;  %5122 = vmatmul.mubr.msk.f32.vlgmr.msra.gmra.mrb[0].mxu0 %vm212_vm1, %v5956_v1  ;;  %v1832_v56 = vld [vmem:[#allocation2 + $0xe1] sm:$0xff] }
 0x115   : > { %4901 = vmatprep.mubr.msk.f32.mxu1 %vm212_vm1, %v6220_v38  ;;  %5124 = vmatprep.mubr.msk.f32.mxu0 %vm212_vm1, %v5962_v4  ;;  %v3407_v1 = vld [vmem:[#allocation2 + $0x1a2] sm:$0xff] }
 0x118   : > { %4902 = vmatmul.mubr.msk.f32.gmra.mrb[20].mxu1 %vm212_vm1, %v6232_v63  ;;  %5125 = vmatmul.mubr.msk.f32.gmra.mrb[2].mxu0 %vm212_vm1, %v5976_v6 }
 0x119   : > { %4904 = vmatprep.mubr.msk.f32.mxu1 %vm212_vm1, %v6234_v42  ;;  %5127 = vmatprep.mubr.msk.f32.mxu0 %vm212_vm1, %v5980_v9 }
 0x11c   : > { %4905 = vmatmul.mubr.msk.f32.gmra.mrb[22].mxu1 %vm212_vm1, %v6244_v45  ;;  %5128 = vmatmul.mubr.msk.f32.gmra.mrb[4].mxu0 %vm212_vm1, %v5992_v11 }
 0x11d   : > { %4907 = vmatprep.mubr.msk.f32.mxu1 %vm212_vm1, %v6246_v8  ;;  %5130 = vmatprep.mubr.msk.f32.mxu0 %vm212_vm1, %v5996_v13 }
 0x120   : > { %4908 = vmatmul.mubr.msk.f32.gmra.mrb[24].mxu1 %vm212_vm1, %v6256_v58  ;;  %5131 = vmatmul.mubr.msk.f32.gmra.mrb[6].mxu0 %vm212_vm1, %v6008_v15 }
 0x121   : > { %4910 = vmatprep.mubr.msk.f32.mxu1 %vm212_vm1, %v6258_v47  ;;  %5133 = vmatprep.mubr.msk.f32.mxu0 %vm212_vm1, %v6012_v17 }
 0x124   : > { %4911 = vmatmul.mubr.msk.f32.gmra.mrb[26].mxu1 %vm212_vm1, %v6268_v20  ;;  %5134 = vmatmul.mubr.msk.f32.gmra.mrb[8].mxu0 %vm212_vm1, %v6024_v19 }
 0x125   : > { %4913 = vmatprep.mubr.msk.f32.mxu1 %vm212_vm1, %v6270_v26  ;;  %5136 = vmatprep.mubr.msk.f32.mxu0 %vm212_vm1, %v6028_v21 }
 0x128   : > { %4914 = vmatmul.mubr.msk.f32.gmra.mrb[28].mxu1 %vm212_vm1, %v6280_v12  ;;  %5137 = vmatmul.mubr.msk.f32.gmra.mrb[10].mxu0 %vm212_vm1, %v6040_v23 }
 0x129   : > { %4916 = vmatprep.mubr.msk.f32.mxu1 %vm212_vm1, %v6340_v55  ;;  %5139 = vmatprep.mubr.msk.f32.mxu0 %vm212_vm1, %v6042_v25 }
 0x12c   : > { %4917 = vmatmul.mubr.msk.f32.gmra.mrb[30].mxu1 %vm212_vm1, %v6350_v60  ;;  %5140 = vmatmul.mubr.msk.f32.gmra.mrb[12].mxu0 %vm212_vm1, %v6051_v27 }
 0x12d   : > { %4945 = vmatprep.mubr.msk.f32.mxu1 %vm212_vm1, %v1831_v54  ;;  %5142 = vmatprep.mubr.msk.f32.mxu0 %vm212_vm1, %v6055_v29 }
 0x130   : > { %4946 = vmatmul.mubr.msk.f32.vlgmr.msra.gmra.mrb[16].mxu1 %vm212_vm1, %v1832_v56  ;;  %5143 = vmatmul.mubr.msk.f32.gmra.mrb[14].mxu0 %vm212_vm1, %v6071_v33 }
 0x131   : > { %4948 = vmatprep.mubr.msk.f32.mxu1 %vm212_vm1, %v6916_v48  ;;  %5145 = vmatprep.mubr.msk.f32.mxu0 %vm212_vm1, %v6077_v39 }
 0x134   : > { %4949 = vmatmul.mubr.msk.f32.gmra.mrb[18].mxu1 %vm212_vm1, %v6918_v50  ;;  %5146 = vmatmul.mubr.msk.f32.gmra.mrb[16].mxu0 %vm212_vm1, %v6091_v40 }
 0x135   : > { %4951 = vmatprep.mubr.msk.f32.mxu1 %vm212_vm1, %v6920_v52  ;;  %5148 = vmatprep.mubr.msk.f32.mxu0 %vm212_vm1, %v6095_v44 }
 0x138   : > { %4952 = vmatmul.mubr.msk.f32.gmra.mrb[20].mxu1 %vm212_vm1, %v6922_v0  ;;  %5149 = vmatmul.mubr.msk.f32.gmra.mrb[18].mxu0 %vm212_vm1, %v6107_v46 }
 0x139   : > { %4954 = vmatprep.mubr.msk.f32.mxu1 %vm212_vm1, %v6924_v2  ;;  %5151 = vmatprep.mubr.msk.f32.mxu0 %vm212_vm1, %v6111_v57 }
 0x13c   : > { %4955 = vmatmul.mubr.msk.f32.gmra.mrb[22].mxu1 %vm212_vm1, %v6926_v16  ;;  %5152 = vmatmul.mubr.msk.f32.gmra.mrb[20].mxu0 %vm212_vm1, %v6123_v24 }
 0x13d   : > { %4957 = vmatprep.mubr.msk.f32.mxu1 %vm212_vm1, %v6928_v35  ;;  %5154 = vmatprep.mubr.msk.f32.mxu0 %vm212_vm1, %v6127_v22 }
 0x140   : > { %4958 = vmatmul.mubr.msk.f32.gmra.mrb[24].mxu1 %vm212_vm1, %v6930_v37  ;;  %5155 = vmatmul.mubr.msk.f32.gmra.mrb[22].mxu0 %vm212_vm1, %v6139_v18 }
 0x141   : > { %4960 = vmatprep.mubr.msk.f32.mxu1 %vm212_vm1, %v6932_v43  ;;  %5157 = vmatprep.mubr.msk.f32.mxu0 %vm212_vm1, %v6143_v14 }
 0x144   : > { %4961 = vmatmul.mubr.msk.f32.gmra.mrb[26].mxu1 %vm212_vm1, %v6934_v51  ;;  %5158 = vmatmul.mubr.msk.f32.gmra.mrb[24].mxu0 %vm212_vm1, %v6155_v10 }
 0x145   : > { %4963 = vmatprep.mubr.msk.f32.mxu1 %vm212_vm1, %v6935_v53  ;;  %5160 = vmatprep.mubr.msk.f32.mxu0 %vm212_vm1, %v6159_v5 }
 0x148   : > { %4964 = vmatmul.mubr.msk.f32.gmra.mrb[28].mxu1 %vm212_vm1, %v6937_v34  ;;  %5161 = vmatmul.mubr.msk.f32.gmra.mrb[26].mxu0 %vm212_vm1, %v6909_v32 }
 0x149   : > { %4966 = vmatprep.mubr.msk.f32.mxu1 %vm212_vm1, %v6474_v30  ;;  %5163 = vmatprep.mubr.msk.f32.mxu0 %vm212_vm1, %v6938_v59 }
 0x14c   : > { %4967 = vmatmul.mubr.msk.f32.gmra.mrb[30].mxu1 %vm212_vm1, %v6484_v36  ;;  %5164 = vmatmul.mubr.msk.f32.gmra.mrb[28].mxu0 %vm212_vm1, %v6939_v62 }
 0x14d   : > { %5166 = vmatprep.mubr.msk.f32.mxu0 %vm212_vm1, %v3406_v61 }
 0x150   : > { %5167 = vmatmul.mubr.msk.f32.gmra.mrb[30].mxu0 %vm212_vm1, %v3407_v1 }
 0x1c3   : > { %v4873_v4 = vpop.f32.mrb[0].mxu1 }
 0x1c4   : > { %v1624_v5 = vpop.f32.mrb[1].mxu1 }
 0x1c7   : > { %v4876_v6 = vpop.f32.mrb[2].mxu1 }
 0x1c8   : > { %v1634_v9 = vpop.f32.mrb[3].mxu1 }
 0x1cb   : > { %v4879_v10 = vpop.f32.mrb[4].mxu1 }
 0x1cc   : > { %v1644_v11 = vpop.f32.mrb[5].mxu1 }
 0x1cf   : > { %v4882_v12 = vpop.f32.mrb[6].mxu1 }
 0x1d0   : > { %v1654_v13 = vpop.f32.mrb[7].mxu1 }
 0x1d3   : > { %v4885_v14 = vpop.f32.mrb[8].mxu1 }
 0x1d4   : > { %v1664_v15 = vpop.f32.mrb[9].mxu1 }
 0x1d7   : > { %v4888_v17 = vpop.f32.mrb[10].mxu1 }
 0x1d8   : > { %v1674_v18 = vpop.f32.mrb[11].mxu1 }
 0x1db   : > { %v6616_v19 = vpop.f32.mrb[12].mxu1 }
 0x1dc   : > { %v6618_v20 = vpop.f32.mrb[13].mxu1 }
 0x1df   : > { %v6620_v21 = vpop.f32.mrb[14].mxu1 }
 0x1e0   : > { %v6622_v22 = vpop.f32.mrb[15].mxu1 }
 0x1e7   : > { %v5123_v23 = vpop.f32.mrb[0].mxu0 }
 0x1e8   : > { %v5171_v25 = vadd.f32 %v5123_v23, %v4873_v4  ;;  %v3575_v27 = vpop.f32.mrb[1].mxu0 }
 0x1e9   : > { %v5172_v28 = vadd.f32 %v3575_v27, %v1624_v5 }
 0x1ea   : > { %v3805_v29 = vmul.f32 %v5171_v25, %v5171_v25 }
 0x1eb   : > { %v3766_v31 = vadd.f32 %v5172_v28, %v5171_v25  ;;  %v3804_v33 = vmul.f32 %v5172_v28, %v5172_v28  ;;  %v5126_v38 = vpop.f32.mrb[2].mxu0  ;;  %3874 = vxpose.xlu0.b32.start [1/16] (narrow) %v5172_v28, 8 }
 0x1ec   : > { %v5173_v39 = vadd.f32 %v5126_v38, %v4876_v6  ;;  %v3585_v8 = vpop.f32.mrb[3].mxu0 }
 0x1ed   : > { %v3836_v40 = vadd.f32 %v3805_v29, %v3804_v33  ;;  %v5174_v42 = vadd.f32 %v3585_v8, %v1634_v9 }
 0x1ee   : > { %v3807_v58 = vmul.f32 %v5173_v39, %v5173_v39 }
 0x1ef   : > { %v3767_v44 = vadd.f32 %v5174_v42, %v3766_v31  ;;  %v3806_v45 = vmul.f32 %v5174_v42, %v5174_v42  ;;  %v5129_v46 = vpop.f32.mrb[4].mxu0  ;;  %3875 = vxpose.xlu0.b32.cont [2/16] (narrow) %v5171_v25, 8 }
 0x1f0   : > { %v5175_v47 = vadd.f32 %v5129_v46, %v4879_v10  ;;  %v3595_v57 = vpop.f32.mrb[5].mxu0 }
 0x1f1   : > { %v3837_v24 = vadd.f32 %v3836_v40, %v3806_v45  ;;  %v5176_v26 = vadd.f32 %v3595_v57, %v1644_v11  ;;  %v3768_v63 = vadd.f32 %v5173_v39, %v3767_v44 }
 0x1f2   : > { %v3809_v0 = vmul.f32 %v5175_v47, %v5175_v47 }
 0x1f3   : > { %v3769_v55 = vadd.f32 %v5176_v26, %v3768_v63  ;;  %v3808_v60 = vmul.f32 %v5176_v26, %v5176_v26  ;;  %v3838_v32 = vadd.f32 %v3837_v24, %v3807_v58  ;;  %v5132_v48 = vpop.f32.mrb[6].mxu0  ;;  %3876 = vxpose.xlu0.b32.cont [3/16] (narrow) %v5174_v42, 8 }
 0x1f4   : > { %v5177_v50 = vadd.f32 %v5132_v48, %v4882_v12  ;;  %v3605_v52 = vpop.f32.mrb[7].mxu0 }
 0x1f5   : > { %v3839_v2 = vadd.f32 %v3838_v32, %v3808_v60  ;;  %v5178_v16 = vadd.f32 %v3605_v52, %v1654_v13  ;;  %v3770_v35 = vadd.f32 %v5175_v47, %v3769_v55 }
 0x1f6   : > { %v3811_v3 = vmul.f32 %v5177_v50, %v5177_v50 }
 0x1f7   : > { %v3771_v37 = vadd.f32 %v5178_v16, %v3770_v35  ;;  %v3810_v43 = vmul.f32 %v5178_v16, %v5178_v16  ;;  %v3840_v49 = vadd.f32 %v3839_v2, %v3809_v0  ;;  %v5135_v51 = vpop.f32.mrb[8].mxu0  ;;  %3877 = vxpose.xlu0.b32.cont [4/16] (narrow) %v5173_v39, 8 }
 0x1f8   : > { %v6624_v53 = vadd.f32 %v5135_v51, %v4885_v14  ;;  %v3615_v30 = vpop.f32.mrb[9].mxu0 }
 0x1f9   : > { %v3841_v34 = vadd.f32 %v3840_v49, %v3810_v43  ;;  %v5180_v36 = vadd.f32 %v3615_v30, %v1664_v15  ;;  %v3772_v7 = vadd.f32 %v5177_v50, %v3771_v37 }
 0x1fa   : > { %v3813_v1 = vmul.f32 %v6624_v53, %v6624_v53 }
 0x1fb   : > { %v3773_v41 = vadd.f32 %v5180_v36, %v3772_v7  ;;  %v3812_v54 = vmul.f32 %v5180_v36, %v5180_v36  ;;  %v3842_v56 = vadd.f32 %v3841_v34, %v3811_v3  ;;  %v5138_v59 = vpop.f32.mrb[10].mxu0  ;;  %3878 = vxpose.xlu0.b32.cont [5/16] (narrow) %v5176_v26, 8 }
 0x1fc   : > { %v6626_v61 = vadd.f32 %v5138_v59, %v4888_v17  ;;  %v3625_v62 = vpop.f32.mrb[11].mxu0 }
 0x1fd   : > { %v3843_v4 = vadd.f32 %v3842_v56, %v3812_v54  ;;  %v6630_v5 = vadd.f32 %v3625_v62, %v1674_v18  ;;  %v3774_v6 = vadd.f32 %v6624_v53, %v3773_v41 }
 0x1fe   : > { %v3815_v15 = vmul.f32 %v6626_v61, %v6626_v61 }
 0x1ff   : > { %v3775_v9 = vadd.f32 %v6630_v5, %v3774_v6  ;;  %v3814_v10 = vmul.f32 %v6630_v5, %v6630_v5  ;;  %v3844_v11 = vadd.f32 %v3843_v4, %v3813_v1  ;;  %v5141_v12 = vpop.f32.mrb[12].mxu0  ;;  %3879 = vxpose.xlu0.b32.cont [6/16] (narrow) %v5175_v47, 8 }
 0x200   : > { %v6637_v13 = vadd.f32 %v5141_v12, %v6616_v19  ;;  %v3635_v14 = vpop.f32.mrb[13].mxu0 }
 0x201   : > { %v3845_v17 = vadd.f32 %v3844_v11, %v3814_v10  ;;  %v6642_v18 = vadd.f32 %v3635_v14, %v6618_v20  ;;  %v3776_v23 = vadd.f32 %v6626_v61, %v3775_v9 }
 0x202   : > { %v3817_v20 = vmul.f32 %v6637_v13, %v6637_v13 }
 0x203   : > { %v3777_v25 = vadd.f32 %v6642_v18, %v3776_v23  ;;  %v3816_v27 = vmul.f32 %v6642_v18, %v6642_v18  ;;  %v3846_v28 = vadd.f32 %v3845_v17, %v3815_v15  ;;  %v5144_v29 = vpop.f32.mrb[14].mxu0  ;;  %3880 = vxpose.xlu0.b32.cont [7/16] (narrow) %v5178_v16, 8  ;;  %v4947_v19 = vpop.f32.mrb[16].mxu1 }
 0x204   : > { %v6649_v31 = vadd.f32 %v5144_v29, %v6620_v21  ;;  %v2094_v33 = vpop.f32.mrb[17].mxu1  ;;  %v3645_v38 = vpop.f32.mrb[15].mxu0 }
 0x205   : > { %v3847_v39 = vadd.f32 %v3846_v28, %v3816_v27  ;;  %v6654_v8 = vadd.f32 %v3645_v38, %v6622_v22  ;;  %v3778_v40 = vadd.f32 %v6637_v13, %v3777_v25 }
 0x206   : > { %v3819_v24 = vmul.f32 %v6649_v31, %v6649_v31 }
 0x207   : > { %v3779_v42 = vadd.f32 %v6654_v8, %v3778_v40  ;;  %v3818_v44 = vmul.f32 %v6654_v8, %v6654_v8  ;;  %v3848_v45 = vadd.f32 %v3847_v39, %v3817_v20  ;;  %v5147_v46 = vpop.f32.mrb[16].mxu0  ;;  %3881 = vxpose.xlu0.b32.cont [8/16] (narrow) %v5177_v50, 8  ;;  %v4950_v21 = vpop.f32.mrb[18].mxu1 }
 0x208   : > { %v5187_v47 = vadd.f32 %v5147_v46, %v4947_v19  ;;  %v2104_v57 = vpop.f32.mrb[19].mxu1  ;;  %v3655_v58 = vpop.f32.mrb[17].mxu0 }
 0x209   : > { %v3849_v26 = vadd.f32 %v3848_v45, %v3818_v44  ;;  %v5188_v22 = vadd.f32 %v3655_v58, %v2094_v33  ;;  %v3780_v63 = vadd.f32 %v6649_v31, %v3779_v42 }
 0x20a   : > { %v3821_v16 = vmul.f32 %v5187_v47, %v5187_v47 }
 0x20b   : > { %v3781_v55 = vadd.f32 %v5188_v22, %v3780_v63  ;;  %v3820_v60 = vmul.f32 %v5188_v22, %v5188_v22  ;;  %v3850_v32 = vadd.f32 %v3849_v26, %v3819_v24  ;;  %v5150_v48 = vpop.f32.mrb[18].mxu0  ;;  %3882 = vxpose.xlu0.b32.cont [9/16] (narrow) %v5180_v36, 8  ;;  %3906 = vxpose.xlu1.b32.start [1/16] (narrow) %v5188_v22, 8  ;;  %v4953_v52 = vpop.f32.mrb[20].mxu1 }
 0x20c   : > { %v5189_v0 = vadd.f32 %v5150_v48, %v4950_v21  ;;  %v2114_v50 = vpop.f32.mrb[21].mxu1  ;;  %v3665_v2 = vpop.f32.mrb[19].mxu0 }
 0x20d   : > { %v3851_v35 = vadd.f32 %v3850_v32, %v3820_v60  ;;  %v5190_v37 = vadd.f32 %v3665_v2, %v2104_v57  ;;  %v3782_v43 = vadd.f32 %v5187_v47, %v3781_v55 }
 0x20e   : > { %v3823_v54 = vmul.f32 %v5189_v0, %v5189_v0 }
 0x20f   : > { %v3783_v49 = vadd.f32 %v5190_v37, %v3782_v43  ;;  %v3822_v51 = vmul.f32 %v5190_v37, %v5190_v37  ;;  %v3852_v30 = vadd.f32 %v3851_v35, %v3821_v16  ;;  %v5153_v3 = vpop.f32.mrb[20].mxu0  ;;  %3883 = vxpose.xlu0.b32.cont [10/16] (narrow) %v6624_v53, 8  ;;  %3907 = vxpose.xlu1.b32.cont [2/16] (narrow) %v5187_v47, 8  ;;  %v4956_v34 = vpop.f32.mrb[22].mxu1 }
 0x210   : > { %v5191_v7 = vadd.f32 %v5153_v3, %v4953_v52  ;;  %v2124_v41 = vpop.f32.mrb[23].mxu1  ;;  %v3675_v36 = vpop.f32.mrb[21].mxu0 }
 0x211   : > { %v3853_v56 = vadd.f32 %v3852_v30, %v3822_v51  ;;  %v5192_v59 = vadd.f32 %v3675_v36, %v2114_v50  ;;  %v3784_v62 = vadd.f32 %v5189_v0, %v3783_v49 }
 0x212   : > { %v3825_v14 = vmul.f32 %v5191_v7, %v5191_v7 }
 0x213   : > { %v3785_v1 = vadd.f32 %v5192_v59, %v3784_v62  ;;  %v3824_v4 = vmul.f32 %v5192_v59, %v5192_v59  ;;  %v3854_v6 = vadd.f32 %v3853_v56, %v3823_v54  ;;  %v5156_v9 = vpop.f32.mrb[22].mxu0  ;;  %3884 = vxpose.xlu0.b32.cont [11/16] (narrow) %v6630_v5, 8  ;;  %3908 = vxpose.xlu1.b32.cont [3/16] (narrow) %v5190_v37, 8  ;;  %v4959_v10 = vpop.f32.mrb[24].mxu1 }
 0x214   : > { %v6665_v11 = vadd.f32 %v5156_v9, %v4956_v34  ;;  %v2134_v53 = vpop.f32.mrb[25].mxu1  ;;  %v3685_v12 = vpop.f32.mrb[23].mxu0 }
 0x215   : > { %v3855_v15 = vadd.f32 %v3854_v6, %v3824_v4  ;;  %v5194_v17 = vadd.f32 %v3685_v12, %v2124_v41  ;;  %v3786_v23 = vadd.f32 %v5191_v7, %v3785_v1 }
 0x216   : > { %v3827_v20 = vmul.f32 %v6665_v11, %v6665_v11 }
 0x217   : > { %v3787_v25 = vadd.f32 %v5194_v17, %v3786_v23  ;;  %v3826_v27 = vmul.f32 %v5194_v17, %v5194_v17  ;;  %v3856_v28 = vadd.f32 %v3855_v15, %v3825_v14  ;;  %v5159_v29 = vpop.f32.mrb[24].mxu0  ;;  %3885 = vxpose.xlu0.b32.cont [12/16] (narrow) %v6626_v61, 8  ;;  %3909 = vxpose.xlu1.b32.cont [4/16] (narrow) %v5189_v0, 8  ;;  %v4962_v19 = vpop.f32.mrb[26].mxu1 }
 0x218   : > { %v5195_v33 = vadd.f32 %v5159_v29, %v4959_v10  ;;  %v2144_v5 = vpop.f32.mrb[27].mxu1  ;;  %v3695_v38 = vpop.f32.mrb[25].mxu0 }
 0x219   : > { %v3857_v39 = vadd.f32 %v3856_v28, %v3826_v27  ;;  %v5196_v40 = vadd.f32 %v3695_v38, %v2134_v53  ;;  %v3788_v42 = vadd.f32 %v6665_v11, %v3787_v25 }
 0x21a   : > { %v3829_v24 = vmul.f32 %v5195_v33, %v5195_v33 }
 0x21b   : > { %v3789_v44 = vadd.f32 %v5196_v40, %v3788_v42  ;;  %v3828_v45 = vmul.f32 %v5196_v40, %v5196_v40  ;;  %v3858_v46 = vadd.f32 %v3857_v39, %v3827_v20  ;;  %v5162_v21 = vpop.f32.mrb[26].mxu0  ;;  %3886 = vxpose.xlu0.b32.cont [13/16] (narrow) %v6642_v18, 8  ;;  %3910 = vxpose.xlu1.b32.cont [5/16] (narrow) %v5192_v59, 8  ;;  %v4965_v61 = vpop.f32.mrb[28].mxu1 }
 0x21c   : > { %v6672_v47 = vadd.f32 %v5162_v21, %v4962_v19  ;;  %v2154_v57 = vpop.f32.mrb[29].mxu1  ;;  %v3705_v58 = vpop.f32.mrb[27].mxu0 }
 0x21d   : > { %v3859_v26 = vadd.f32 %v3858_v46, %v3828_v45  ;;  %v5198_v22 = vadd.f32 %v3705_v58, %v2144_v5  ;;  %v3790_v63 = vadd.f32 %v5195_v33, %v3789_v44 }
 0x21e   : > { %v3831_v2 = vmul.f32 %v6672_v47, %v6672_v47 }
 0x21f   : > { %v3791_v55 = vadd.f32 %v5198_v22, %v3790_v63  ;;  %v3830_v60 = vmul.f32 %v5198_v22, %v5198_v22  ;;  %v3860_v32 = vadd.f32 %v3859_v26, %v3829_v24  ;;  %v5165_v48 = vpop.f32.mrb[28].mxu0  ;;  %3887 = vxpose.xlu0.b32.cont [14/16] (narrow) %v6637_v13, 8  ;;  %3911 = vxpose.xlu1.b32.cont [6/16] (narrow) %v5191_v7, 8  ;;  %v4968_v52 = vpop.f32.mrb[30].mxu1 }
 0x220   : > { %v6675_v0 = vadd.f32 %v5165_v48, %v4965_v61  ;;  %v2164_v18 = vpop.f32.mrb[31].mxu1  ;;  %v3715_v50 = vpop.f32.mrb[29].mxu0 }
 0x221   : > { %v3861_v16 = vadd.f32 %v3860_v32, %v3830_v60  ;;  %v6679_v35 = vadd.f32 %v3715_v50, %v2154_v57  ;;  %v3792_v37 = vadd.f32 %v6672_v47, %v3791_v55 }
 0x222   : > { %v3833_v34 = vmul.f32 %v6675_v0, %v6675_v0 }
 0x223   : > { %v3793_v43 = vadd.f32 %v6679_v35, %v3792_v37  ;;  %v3832_v49 = vmul.f32 %v6679_v35, %v6679_v35  ;;  %v3862_v13 = vadd.f32 %v3861_v16, %v3831_v2  ;;  %v5168_v51 = vpop.f32.mrb[30].mxu0  ;;  %3888 = vxpose.xlu0.b32.cont [15/16] (narrow) %v6654_v8, 8  ;;  %3912 = vxpose.xlu1.b32.cont [7/16] (narrow) %v5194_v17, 8 }
 0x224   : > { %v6686_v30 = vadd.f32 %v5168_v51, %v4968_v52  ;;  %v3725_v3 = vpop.f32.mrb[31].mxu0 }
 0x225   : > { %v3863_v7 = vadd.f32 %v3862_v13, %v3832_v49  ;;  %v6690_v41 = vadd.f32 %v3725_v3, %v2164_v18  ;;  %v3794_v36 = vadd.f32 %v6675_v0, %v3793_v43 }
 0x226   : > { %v3835_v8 = vmul.f32 %v6686_v30, %v6686_v30 }
 0x227   : > { %v3795_v54 = vadd.f32 %v6690_v41, %v3794_v36  ;;  %v3834_v56 = vmul.f32 %v6690_v41, %v6690_v41  ;;  %v3864_v59 = vadd.f32 %v3863_v7, %v3833_v34  ;;  %3889 = vxpose.xlu0.b32.end [16/16] (narrow) %v6649_v31, 8  ;;  %3913 = vxpose.xlu1.b32.cont [8/16] (narrow) %v6665_v11, 8 }
 0x229   : > { %v3796_v62 = vadd.f32 %v6686_v30, %v3795_v54  ;;  %v3865_v1 = vadd.f32 %v3864_v59, %v3834_v56 }
 0x22b   : > { %v3797_v4 = vrot.slane %v3796_v62, 4  ;;  %v3866_v6 = vadd.f32 %v3865_v1, %v3835_v8  ;;  %3914 = vxpose.xlu1.b32.cont [9/16] (narrow) %v5196_v40, 8 }
 0x22d   : > { %v3798_v9 = vadd.f32 %v3797_v4, %v3796_v62  ;;  %v3867_v10 = vrot.slane %v3866_v6, 4 }
 0x22f   : > { %v3868_v31 = vadd.f32 %v3867_v10, %v3866_v6  ;;  %3915 = vxpose.xlu1.b32.cont [10/16] (narrow) %v5195_v33, 8  ;;  %v3799_v11 = vrot.slane %v3798_v9, 2 }
 0x231   : > { %v3800_v53 = vadd.f32 %v3799_v11, %v3798_v9  ;;  %v3869_v12 = vrot.slane %v3868_v31, 2 }
 0x233   : > { %3916 = vxpose.xlu1.b32.cont [11/16] (narrow) %v5198_v22, 8  ;;  %v3801_v14 = vrot.slane %v3800_v53, 1  ;;  %v3870_v15 = vadd.f32 %v3869_v12, %v3868_v31 }
 0x235   : > { %v3802_v17 = vadd.f32 %v3801_v14, %v3800_v53  ;;  %v3871_v23 = vrot.slane %v3870_v15, 1 }
 0x237   : > { %3917 = vxpose.xlu1.b32.cont [12/16] (narrow) %v6672_v47, 8  ;;  %3803 = vst [vmem:[%s200_s11] sm:$0x1] %v3802_v17  ;;  %v3872_v25 = vadd.f32 %v3871_v23, %v3870_v15 }
 0x238   : > { %5490 = shalt.err (!%p5487_p3)
}
 0x239   : > { %s5491_s9 = scalar_lea.hbm %s6713_s27, 16  ;;  %s5495_s28 = scalar_lea.hbm %s6830_s3, 32 }
 0x23a   : > { %p5492_p4 = scmp.ne.s32.totalorder %s6713_s27, %s5491_s9  ;;  %p5496_p9 = scmp.lt.u32.totalorder %s6713_s27, %s6830_s3 }
 0x23b   : > { %p5497_p10 = scmp.lt.u32.totalorder %s5495_s28, %s5491_s9  ;;  %p5499_p12 = scmp.lt.u32.totalorder %s5491_s9, %s6713_s27 }
 0x23c   : > { %p5493_p7 = pnand %p5492_p4, %p5670_p5 }
 0x23d   : > { %p5498_p11 = por %p5497_p10, %p5496_p9 }
 0x23e   : > { %p5494_p8 = pneg %p5493_p7 }
 0x23f   : > { %p5500_p13 = por %p5499_p12, %p5498_p11 }
 0x241   : > { %p5501_p0 = pnand %p5500_p13, %p5494_p8 }
 0x243   : > { %5504 = shalt.err (!%p5501_p0)
}
 0x244   : > { %5428 = dma.vmem_to_hbm [thread:$0]  (%p5670_p5), %s6715_s12, 16, %s6713_s27, %s6725_s5   ;;  %3873 = vst [vmem:[%s206_s13] sm:$0x1] %v3872_v25 }
 0x245   : > { %s5505_s6 = scalar_lea.vmem %s6723_s14, 16  ;;  %s5603_s22 = smov [#allocation7]  }
 0x246   : > { %p5506_p1 = scmp.ne.s32.totalorder %s6723_s14, %s5505_s6  ;;  %s5509_s23 = sshll.u32 %s5603_s22, 4  ;;  %s5510_s23 = int_to_ptr.vmem [resolvable:$false] %s5509_s23 }
 0x247   : > { %s5511_s9 = scalar_lea.vmem %s5510_s23, 32  ;;  %p5512_p4 = scmp.lt.s32.totalorder %s6723_s14, %s5510_s23 }
 0x248   : > { %p5507_p2 = pnand %p5506_p1, %p5670_p5  ;;  %p5513_p7 = scmp.lt.s32.totalorder %s5511_s9, %s5505_s6 }
 0x24a   : > { %p5508_p3 = pneg %p5507_p2  ;;  %p5514_p8 = por %p5513_p7, %p5512_p4 }
 0x24c   : > { %p5515_p9 = pnand %p5514_p8, %p5508_p3 }
 0x24e   : > { %5518 = shalt.err (!%p5515_p9)
}
 0x24f   : > { %s5519_s12 = scalar_lea.hbm %s6721_s30, 16  ;;  %s5523_s10 = scalar_lea.hbm %s6831_s4, 32 }
 0x250   : > { %p5520_p10 = scmp.ne.s32.totalorder %s6721_s30, %s5519_s12  ;;  %p5524_p13 = scmp.lt.u32.totalorder %s6721_s30, %s6831_s4 }
 0x251   : > { %p5525_p0 = scmp.lt.u32.totalorder %s5523_s10, %s5519_s12  ;;  %p5527_p2 = scmp.lt.u32.totalorder %s5519_s12, %s6721_s30 }
 0x252   : > { %p5521_p11 = pnand %p5520_p10, %p5670_p5 }
 0x253   : > { %p5526_p1 = por %p5525_p0, %p5524_p13 }
 0x254   : > { %p5522_p12 = pneg %p5521_p11 }
 0x255   : > { %p5528_p3 = por %p5527_p2, %p5526_p1 }
 0x257   : > { %p5529_p4 = pnand %p5528_p3, %p5522_p12 }
 0x259   : > { %5532 = shalt.err (!%p5529_p4)
}
 0x25a   : > { %5429 = dma.vmem_to_hbm [thread:$0]  (%p5670_p5), %s6723_s14, 16, %s6721_s30, %s6725_s5   ;;  %3918 = vxpose.xlu1.b32.cont [13/16] (narrow) %v6679_v35, 8 }
 0x25b   : > { %s4105_s29 = sshll.u32 %s6702_s8, 4  ;;  %s4421_s22 = sshll.u32 %s5651_s19, 8 }
 0x25c   : > { %s194_s7 = scalar_lea.vmem [#allocation3], %s4105_s29  ;;  %s6784_s14 = scalar_lea.hbm %s6829_s2, %s4421_s22 }
 0x25d   : > { %s3963_s6 = sshll.u32 %s194_s7, 4  ;;  %s3941_s30 = scalar_lea.sflag [#allocation4], %s6702_s8  ;;  %s6779_s6 = int_to_ptr.vmem [resolvable:$true] %s3963_s6 }
 0x25e   : > { %3919 = vxpose.xlu1.b32.cont [14/16] (narrow) %v6675_v0, 8  ;;  %s5533_s5 = scalar_lea.vmem %s6779_s6, 256  ;;  %s5604_s12 = smov [#allocation3]  }
 0x25f   : > { %p5534_p7 = scmp.ne.s32.totalorder %s6779_s6, %s5533_s5  ;;  %s5537_s19 = sshll.u32 %s5604_s12, 4  ;;  %s5538_s19 = int_to_ptr.vmem [resolvable:$false] %s5537_s19 }
 0x260   : > { %s5539_s13 = scalar_lea.vmem %s5538_s19, 512  ;;  %p5540_p10 = scmp.lt.s32.totalorder %s6779_s6, %s5538_s19 }
 0x261   : > { %p5535_p8 = pnand %p5534_p7, %p5670_p5  ;;  %p5541_p11 = scmp.lt.s32.totalorder %s5539_s13, %s5533_s5 }
 0x262   : > { %3920 = vxpose.xlu1.b32.cont [15/16] (narrow) %v6690_v41, 8 }
 0x263   : > { %p5536_p9 = pneg %p5535_p8  ;;  %p5542_p12 = por %p5541_p11, %p5540_p10 }
 0x265   : > { %p5543_p13 = pnand %p5542_p12, %p5536_p9 }
 0x266   : > { %3921 = vxpose.xlu1.b32.end [16/16] (narrow) %v6686_v30, 8 }
 0x26b   : > { %v3890_v27 = vpop.trf.xlu0 }
 0x26c   : > { %3938 = vst [vmem:[%s194_s7] sm:$0xff] %v3890_v27 }
 0x2aa   : > { %v3922_v28 = vpop.trf.xlu1 }
 0x2ab   : > { %3939 = vst [vmem:[%s194_s7 + $0x8] sm:$0xff] %v3922_v28 }
 0x2ac   : > { %5546 = shalt.err (!%p5543_p13)
}
 0x2ad   : > { %s5547_s8 = scalar_lea.hbm %s6784_s14, 256  ;;  %s5551_s11 = scalar_lea.hbm %s6829_s2, 512 }
 0x2ae   : > { %p5548_p0 = scmp.ne.s32.totalorder %s6784_s14, %s5547_s8  ;;  %p5552_p3 = scmp.lt.u32.totalorder %s6784_s14, %s6829_s2 }
 0x2af   : > { %p5553_p4 = scmp.lt.u32.totalorder %s5551_s11, %s5547_s8  ;;  %p5555_p8 = scmp.lt.u32.totalorder %s5547_s8, %s6784_s14 }
 0x2b0   : > { %p5549_p1 = pnand %p5548_p0, %p5670_p5 }
 0x2b1   : > { %p5554_p7 = por %p5553_p4, %p5552_p3 }
 0x2b2   : > { %p5550_p2 = pneg %p5549_p1 }
 0x2b3   : > { %p5556_p9 = por %p5555_p8, %p5554_p7 }
 0x2b5   : > { %p5557_p10 = pnand %p5556_p9, %p5550_p2 }
 0x2b7   : > { %5560 = shalt.err (!%p5557_p10)
}
 0x2b8   : > { %5427 = dma.vmem_to_hbm [thread:$0]  (%p5670_p5), %s6779_s6, 256, %s6784_s14, %s3941_s30  }
 0x2b9 PF: > { %p5443_p11 = scmp.ge.s32.totalorder %s5599_s18, 2  ;;  %s4001_s7 = sand.u32 1, %s5587_s15  }
 0x2ba   : > { %s4002_s22 = scalar_lea.sflag [#allocation4], %s4001_s7 }
 0x2bb   : > { %p5434_p12 = pnand %p5443_p11, %p5674_p6 }
 0x2bd   : > { %5578 = dma.done.wait (!%p5434_p12), %s4002_s22, 256  }
 0x2be   : > { %5580 = vsyncadd (!%p5434_p12), %s4002_s22, 4294967040  ;;  %s4010_s23 = sand.u32 1, %s4101_s20  }
 0x2bf   : > { %s4011_s9 = scalar_lea.sflag [#allocation6], %s4010_s23 }
 0x2c0   : > { %5582 = dma.done.wait (!%p5434_p12), %s4011_s9, 32  }
 0x2c1   : > { %5584 = vsyncadd (!%p5434_p12), %s4011_s9, 4294967264  ;;  %p18_p5 = scmp.ge.s32.totalorder %s5655_s21, 4   ;;  %s6940_s15 = smov %s5591_s16 }
 0x2c2   : > { %s6941_s16 = smov %s5595_s17  ;;  %s6942_s17 = smov %s5668_s24 }
 0x2c3   : > { %s6943_s18 = smov %s5655_s21  ;;  %20 = sbr.rel (!%p18_p5) target bundleno = 5 (0x5), region = 106 }
 0x2ca   :  { %4023 = vsyncpa [#allocation4], 1 }
 0x2cb   :  { %4025 = vsyncpa [#allocation4 + $0x1], 1 }
 0x2cc   :  { %4026 = vsyncpa [#allocation6], 1 }
 0x2cd   :  { %4028 = vsyncpa [#allocation6 + $0x1], 1 }

</bundles_post_ra>
